<compile_context>
chip_gen: v6e
topology: v6e:2x2x1
jax: 0.10.0
libtpu: 0.0.40
codegen_flags: <defaults>
</compile_context>

<pallas_src>
import functools

import jax
import jax.numpy as jnp
from jax.experimental import pallas as pl
from jax.experimental.pallas import tpu as pltpu


def _linear_relu_kernel(x_ref, w_ref, b_ref, o_ref, acc_ref):
    """One (i, j, k) grid step of y = relu(x @ W + b).

    Grid = (M_tiles, N_tiles, K_tiles); K is the reduction axis (last,
    arbitrary).  acc_ref is a VMEM f32 accumulator resident across K.
    x/W tiles are bf16; accumulation happens in f32 on the MXU.
    """
    k = pl.program_id(2)

    @pl.when(k == 0)
    def _():
        acc_ref[...] = jnp.zeros_like(acc_ref)

    acc_ref[...] += jnp.dot(
        x_ref[...], w_ref[...], preferred_element_type=jnp.float32
    )

    @pl.when(k == pl.num_programs(2) - 1)
    def _():
        y = acc_ref[...] + b_ref[...]          # bias broadcast (1, tn) -> (B, tn)
        o_ref[...] = jnp.maximum(y, 0.0).astype(o_ref.dtype)


@functools.partial(jax.jit, static_argnames=("tn", "tk", "out_dtype"))
def linear_relu(x, w, b, *, tn=1024, tk=1024, out_dtype=jnp.bfloat16):
    """y = relu(x @ w + b) with x: (B, K), w: (K, N), b: (N,).

    x and w are cast to bf16 for streaming; accumulation is f32.
    """
    B, K = x.shape
    K2, N = w.shape
    assert K == K2 and b.shape == (N,)
    assert K % tk == 0 and N % tn == 0, "feature dims must tile evenly"

    x = x.astype(jnp.bfloat16)
    w = w.astype(jnp.bfloat16)
    b2 = b.astype(jnp.float32).reshape(1, N)

    grid = (1, N // tn, K // tk)  # single M tile (tiny batch, kept whole)

    out_bytes = jnp.dtype(out_dtype).itemsize
    cost = pl.CostEstimate(
        flops=2 * B * K * N,
        transcendentals=0,
        bytes_accessed=(K * N * 2          # bf16 weights (dominant)
                        + B * K * 2        # bf16 activations in
                        + N * 4            # f32 bias
                        + B * N * out_bytes),
    )

    return pl.pallas_call(
        _linear_relu_kernel,
        out_shape=jax.ShapeDtypeStruct((B, N), out_dtype),
        grid_spec=pltpu.PrefetchScalarGridSpec(
            num_scalar_prefetch=0,
            grid=grid,
            in_specs=[
                pl.BlockSpec((B, tk), lambda i, j, k: (0, k)),   # x tile (bf16)
                pl.BlockSpec((tk, tn), lambda i, j, k: (k, j)),  # W tile (bf16)
                pl.BlockSpec((1, tn), lambda i, j, k: (0, j)),   # bias tile (f32)
            ],
            out_specs=pl.BlockSpec((B, tn), lambda i, j, k: (0, j)),
            scratch_shapes=[pltpu.VMEM((B, tn), jnp.float32)],
        ),
        compiler_params=pltpu.CompilerParams(
            dimension_semantics=("parallel", "parallel", "arbitrary"),
        ),
        cost_estimate=cost,
    )(x, w, b2)


def init_classifier_params(key, in_features=256 * 6 * 6, hidden=4096):
    """Deterministic synthetic parameters (shapes match the PyTorch module).

    Weights are stored as (in, out) == PyTorch weight.T, in bf16 (the HBM
    stream).  Biases stay f32.
    """
    k6w, k6b, k7w, k7b = jax.random.split(key, 4)
    w6 = (jax.random.normal(k6w, (in_features, hidden), jnp.float32) * 0.01
          ).astype(jnp.bfloat16)
    b6 = jax.random.normal(k6b, (hidden,), jnp.float32) * 0.01
    w7 = (jax.random.normal(k7w, (hidden, hidden), jnp.float32) * 0.01
          ).astype(jnp.bfloat16)
    b7 = jax.random.normal(k7b, (hidden,), jnp.float32) * 0.01
    return {"w6": w6, "b6": b6, "w7": w7, "b7": b7}


def classifier_forward(params, x):
    """x: (B, 9216) float32 -> (B, 4096) float32."""
    # fc6 + relu6 (+ drop6 = identity); keep the intermediate in bf16 so fc7
    # streams a bf16 activation too.
    h = linear_relu(x, params["w6"], params["b6"], out_dtype=jnp.bfloat16)
    # fc7 + relu7 (+ drop7 = identity); final output back to f32.
    y = linear_relu(h, params["w7"], params["b7"], out_dtype=jnp.float32)
    return y


if __name__ == "__main__":
    key = jax.random.PRNGKey(0)
    kp, kx = jax.random.split(key)

    params = init_classifier_params(kp)

    batch = 2
    x = jax.random.normal(kx, (batch, 256 * 6 * 6), jnp.float32)

    out = classifier_forward(params, x)
    out = jax.block_until_ready(out)

    # Reference mirroring the kernel's numerics (bf16 inputs/weights, f32
    # accumulation, bf16 intermediate), computed with full-precision matmuls.
    hp = jax.lax.Precision.HIGHEST
    xq = x.astype(jnp.bfloat16).astype(jnp.float32)
    w6f = params["w6"].astype(jnp.float32)
    w7f = params["w7"].astype(jnp.float32)
    h_ref = jnp.maximum(jnp.dot(xq, w6f, precision=hp) + params["b6"], 0.0)
    h_ref_q = h_ref.astype(jnp.bfloat16).astype(jnp.float32)
    ref = jnp.maximum(jnp.dot(h_ref_q, w7f, precision=hp) + params["b7"], 0.0)

    assert out.shape == (batch, 4096)
    assert out.dtype == jnp.float32
    assert bool(jnp.all(out >= 0.0))
    assert bool(jnp.all(jnp.isfinite(out)))
    assert bool(jnp.allclose(out, ref, atol=1e-2, rtol=1e-2))

    print("KERNEL_OK")
</pallas_src>

<mosaic_0001>
module attributes {stable_mosaic.version = 11 : i64} {
  func.func @_linear_relu_kernel(%arg0: i32, %arg1: i32, %arg2: i32, %arg3: memref<2x1024xbf16, #tpu.memory_space<vmem>>, %arg4: memref<1024x1024xbf16, #tpu.memory_space<vmem>>, %arg5: memref<1x1024xf32, #tpu.memory_space<vmem>>, %arg6: memref<2x1024xbf16, #tpu.memory_space<vmem>>, %arg7: memref<2x1024xf32, #tpu.memory_space<vmem>>) attributes {dimension_semantics = [#tpu.dimension_semantics<parallel>, #tpu.dimension_semantics<parallel>, #tpu.dimension_semantics<arbitrary>], iteration_bounds = array<i64: 1, 4, 9>, scalar_prefetch = 0 : i64, scratch_operands = 1 : i64, tpu.core_type = #tpu.core_type<tc>, window_params = [{transform_indices = @transform_0, window_bounds = array<i64: 2, 1024>}, {transform_indices = @transform_1, window_bounds = array<i64: 1024, 1024>}, {transform_indices = @transform_2, window_bounds = array<i64: 1, 1024>}, {transform_indices = @transform_3, window_bounds = array<i64: 2, 1024>}]} {
    %c0_i32 = arith.constant 0 : i32
    %0 = arith.cmpi eq, %arg2, %c0_i32 : i32
    %1 = arith.extui %0 : i1 to i32
    %c0_i32_0 = arith.constant 0 : i32
    %2 = arith.cmpi ne, %1, %c0_i32_0 : i32
    scf.if %2 {
      %cst_9 = arith.constant 0.000000e+00 : f32
      %12 = vector.broadcast %cst_9 : f32 to vector<2x1024xf32>
      %c0_10 = arith.constant 0 : index
      %c0_11 = arith.constant 0 : index
      %13 = vector.load %arg7[%c0_10, %c0_11] : memref<2x1024xf32, #tpu.memory_space<vmem>>, vector<2x1024xf32>
      tpu.vector_store %arg7[%c0_10, %c0_11], %12 {strides = array<i32>} : memref<2x1024xf32, #tpu.memory_space<vmem>>, vector<2x1024xf32>,
    } else {
    }
    %c0 = arith.constant 0 : index
    %c0_1 = arith.constant 0 : index
    %3 = vector.load %arg7[%c0, %c0_1] : memref<2x1024xf32, #tpu.memory_space<vmem>>, vector<2x1024xf32>
    %c0_2 = arith.constant 0 : index
    %c0_3 = arith.constant 0 : index
    %4 = vector.load %arg3[%c0_2, %c0_3] : memref<2x1024xbf16, #tpu.memory_space<vmem>>, vector<2x1024xbf16>
    %c0_4 = arith.constant 0 : index
    %c0_5 = arith.constant 0 : index
    %5 = vector.load %arg4[%c0_4, %c0_5] : memref<1024x1024xbf16, #tpu.memory_space<vmem>>, vector<1024x1024xbf16>
    %cst = arith.constant dense<0.000000e+00> : vector<2x1024xf32>
    %6 = tpu.matmul %4, %5, %cst {dimension_numbers = #tpu.dot_dimension_numbers<[1], [0], [0], [1], [0, 0, 1, 1], [], []>} : vector<2x1024xbf16>, vector<1024x1024xbf16>, vector<2x1024xf32> -> vector<2x1024xf32>
    %7 = arith.addf %3, %6 : vector<2x1024xf32>
    %c0_6 = arith.constant 0 : index
    %c0_7 = arith.constant 0 : index
    %8 = vector.load %arg7[%c0_6, %c0_7] : memref<2x1024xf32, #tpu.memory_space<vmem>>, vector<2x1024xf32>
    tpu.vector_store %arg7[%c0_6, %c0_7], %7 {strides = array<i32>} : memref<2x1024xf32, #tpu.memory_space<vmem>>, vector<2x1024xf32>,
    %c8_i32 = arith.constant 8 : i32
    %9 = arith.cmpi eq, %arg2, %c8_i32 : i32
    %10 = arith.extui %9 : i1 to i32
    %c0_i32_8 = arith.constant 0 : i32
    %11 = arith.cmpi ne, %10, %c0_i32_8 : i32
    scf.if %11 {
      %c0_9 = arith.constant 0 : index
      %c0_10 = arith.constant 0 : index
      %12 = vector.load %arg7[%c0_9, %c0_10] : memref<2x1024xf32, #tpu.memory_space<vmem>>, vector<2x1024xf32>
      %c0_11 = arith.constant 0 : index
      %c0_12 = arith.constant 0 : index
      %13 = vector.load %arg5[%c0_11, %c0_12] : memref<1x1024xf32, #tpu.memory_space<vmem>>, vector<1x1024xf32>
      %14 = vector.broadcast %13 : vector<1x1024xf32> to vector<2x1024xf32>
      %15 = arith.addf %12, %14 : vector<2x1024xf32>
      %cst_13 = arith.constant 0.000000e+00 : f32
      %16 = vector.broadcast %cst_13 : f32 to vector<2x1024xf32>
      %17 = arith.maximumf %15, %16 : vector<2x1024xf32>
      %18 = arith.truncf %17 : vector<2x1024xf32> to vector<2x1024xbf16>
      %c0_14 = arith.constant 0 : index
      %c0_15 = arith.constant 0 : index
      %19 = vector.load %arg6[%c0_14, %c0_15] : memref<2x1024xbf16, #tpu.memory_space<vmem>>, vector<2x1024xbf16>
      tpu.vector_store %arg6[%c0_14, %c0_15], %18 {strides = array<i32>} : memref<2x1024xbf16, #tpu.memory_space<vmem>>, vector<2x1024xbf16>,
    } else {
    }
    return
  }
  func.func @transform_0(%arg0: i32, %arg1: i32, %arg2: i32) -> (i32, i32) {
    %c0_i32 = arith.constant 0 : i32
    %c0_i32_0 = arith.constant 0 : i32
    return %c0_i32, %arg2 : i32, i32
  }
  func.func @transform_1(%arg0: i32, %arg1: i32, %arg2: i32) -> (i32, i32) {
    %c0_i32 = arith.constant 0 : i32
    return %arg2, %arg1 : i32, i32
  }
  func.func @transform_2(%arg0: i32, %arg1: i32, %arg2: i32) -> (i32, i32) {
    %c0_i32 = arith.constant 0 : i32
    %c0_i32_0 = arith.constant 0 : i32
    return %c0_i32, %arg1 : i32, i32
  }
  func.func @transform_3(%arg0: i32, %arg1: i32, %arg2: i32) -> (i32, i32) {
    %c0_i32 = arith.constant 0 : i32
    %c0_i32_0 = arith.constant 0 : i32
    return %c0_i32, %arg1 : i32, i32
  }
}

</mosaic_0001>

<bundles_post_ra>
// kernel: linear_relu.1
= control target key start
LH: loop header
LB: loop body
LE: loop exit
PB: predicated region body
PF: predicated region fallthrough
CT: control target
= control target key end

     0   :  { %s6206_s0 = inlined_call_operand.vmem [shape: bf16[2,9216], index: 0, kind: input, shape index: {}]   ;;  %s6207_s1 = inlined_call_operand.hbm [shape: bf16[9216,4096], index: 1, kind: input, shape index: {}]   ;;  %s6208_s2 = inlined_call_operand.hbm [shape: f32[1,4096], index: 2, kind: input, shape index: {}]   ;;  %s6209_s3 = inlined_call_operand.hbm [shape: bf16[2,4096], index: 3, kind: output, shape index: {}]  }
   0x1   :  { %6214 = sst [smem:[#allocation15_spill]] %s6207_s1 }
   0x2   :  { %8 = vsyncpa [#allocation4], 0 }
   0x3   :  { %10 = vsyncpa [#allocation4 + $0x1], 0 }
   0x4   :  { %11 = vsyncpa [#allocation7], 0 }
   0x5   :  { %13 = vsyncpa [#allocation7 + $0x1], 0 }
   0x6   :  { %14 = vsyncpa [#allocation5], 0 }
   0x7   :  { %16 = vsyncpa [#allocation5 + $0x1], 0  ;;  %s5307_s12 = smov 0   ;;  %s5309_s13 = smov 0  }
   0x8   :  { %s5311_s14 = smov 0   ;;  %s5313_s15 = smov 0  }
   0x9   :  { %s5315_s16 = smov 0   ;;  %s5317_s17 = smov 0  }
   0xa   :  { %s5319_s18 = smov 0   ;;  %s5321_s19 = smov 0  }
   0xb   :  { %s5323_s20 = smov 0   ;;  %s5325_s21 = smov 0  }
   0xc   :  { %s5327_s22 = smov 0  }
   0xd LB: > { %6215 = sst [smem:[#allocation12_spill]] %s5272_s21  ;;  %s34_s23 = sadd.s32 1, %s5268_s20  ;;  %s5276_s22 = sphi %s5327_s22, %s22_s22   ;;  %s5272_s21 = sphi %s5325_s21, %s6232_s21   ;;  %s5268_s20 = sphi %s5323_s20, %s6240_s20   ;;  %s5264_s19 = sphi %s5321_s19, %s6230_s19   ;;  %s5260_s18 = sphi %s5319_s18, %s6239_s18   ;;  %s5256_s17 = sphi %s5317_s17, %s6238_s17   ;;  %s5252_s16 = sphi %s5315_s16, %s6237_s16   ;;  %s5248_s15 = sphi %s5313_s15, %s6236_s15   ;;  %s5244_s14 = sphi %s5311_s14, %s6235_s14   ;;  %s5240_s13 = sphi %s5309_s13, %s6234_s13   ;;  %s5236_s12 = sphi %s5307_s12, %s6233_s12  }
   0xe   : > { %p5363_p0 = scmp.ge.s32.totalorder %s34_s23, 9  ;;  %p83_p1 = scmp.ne.s32.totalorder %s5256_s17, %s5252_s16 }
   0xf   : > { %p84_p2 = scmp.eq.s32.totalorder %s5276_s22, 0  ;;  %p4999_p4 = scmp.lt.s32.totalorder %s5276_s22, 36 }
  0x10   : > { %s6242_s23 = smov (%p5363_p0, %s34_s23), 0  ;;  %s173_s26 = sand.u32 1, %s5256_s17  }
  0x11   : > { %6217 = sst [smem:[#allocation13_spill]] %s6242_s23  ;;  %p85_p3 = por %p84_p2, %p83_p1 }
  0x12   : > { %s4443_s27 = sshll.u32 %s173_s26, 12  ;;  %s4445_s28 = sshll.u32 %s5272_s21, 3 }
  0x13   : > { %s4979_s29 = sshll.u32 %s5268_s20, 12  ;;  %s177_s30 = scalar_lea.vmem [#allocation3], %s4443_s27 }
  0x14   : > { %s187_s4 = sshll.u32 %s177_s30, 4  ;;  %s184_s5 = sadd.s32 %s4979_s29, %s4445_s28  ;;  %s188_s4 = int_to_ptr.vmem [resolvable:$true] %s187_s4 }
  0x15   : > { %s4447_s6 = sshll.u32 %s184_s5, 6  ;;  %p5383_p5 = pnand %p4999_p4, %p85_p3 }
  0x16   : > { %s6219_s1 = sld [smem:[#allocation15_spill]]  ;;  %p4451_p6 = scmp.ge.s32.totalorder %s5276_s22, 1 }
  0x17   : > { %s174_s11 = scalar_lea.sflag [#allocation4], %s173_s26  ;;  %p5098_p7 = pneg %p5383_p5 }
  0x18   : > { %s5109_s25 = scalar_lea.vmem %s188_s4, 65536  ;;  %s5278_s27 = smov [#allocation3]  }
  0x19   : > { %p5110_p8 = scmp.ne.s32.totalorder %s188_s4, %s5109_s25  ;;  %s5114_s28 = sshll.u32 %s5278_s27, 4  ;;  %s5115_s28 = int_to_ptr.vmem [resolvable:$false] %s5114_s28 }
  0x1a   : > { %s5116_s29 = scalar_lea.vmem %s5115_s28, 131072  ;;  %p5117_p11 = scmp.lt.s32.totalorder %s188_s4, %s5115_s28 }
  0x1b   : > { %p5112_p9 = pnand %p5110_p8, %p5098_p7  ;;  %p5118_p12 = scmp.lt.s32.totalorder %s5116_s29, %s5109_s25 }
  0x1c   : > { %s186_s10 = scalar_lea.hbm %s6219_s1, %s4447_s6 }
  0x1d   : > { %p5113_p10 = pneg %p5112_p9  ;;  %p5119_p13 = por %p5118_p12, %p5117_p11 }
  0x1f   : > { %p5120_p1 = pnand %p5119_p13, %p5113_p10 }
  0x21   : > { %5123 = shalt.err (!%p5120_p1)
}
  0x22   : > { %s5279_s30 = smov 2048   ;;  %s5280_s25 = smov 512  }
  0x23   : > { %s5281_s26 = smov 32   ;;  %p214_p3 = scmp.lt.s32.totalorder %s5276_s22, 37 }
  0x24   : > { %4991 = dma.hbm_to_vmem [thread:$0]  (!%p5383_p5), %s186_s10, 65536, %s188_s4, %s174_s11, %s5279_s30, %s5280_s25, %s5281_s26  }
  0x25   : > { %p5398_p7 = pnand %p4451_p6, %p214_p3  ;;  %s71_s6 = ssub.s32 %s5268_s20, %s6242_s23 }
  0x26   : > { %s4439_s8 = sadd.s32 4294967295, %s5276_s22   ;;  %s37_s9 = sadd.s32 1, %s5272_s21 }
  0x27   : > { %p89_p8 = scmp.ne.s32.totalorder %s5252_s16, %s5248_s15  ;;  %s6244_s9 = smov (!%p5363_p0, %s37_s9), %s5272_s21 }
  0x28   : > { %s4440_s7 = sadd.s32 4294967294, %s5276_s22   ;;  %p90_p5 = scmp.eq.s32.totalorder %s4439_s8, 0 }
  0x29   : > { %p39_p9 = scmp.ge.s32.totalorder %s6244_s9, 4  ;;  %s102_s4 = sadd.s32 1, %s5244_s14 }
  0x2a   : > { %p5413_p10 = por %p90_p5, %p89_p8  ;;  %p115_p6 = scmp.ne.s32.totalorder %s5240_s13, %s5236_s12 }
  0x2b   : > { %s6246_s9 = smov (%p39_p9, %s6244_s9), 0  ;;  %p109_p0 = scmp.ne.s32.totalorder %s5244_s14, %s5240_s13 }
  0x2c   : > { %6222 = sst [smem:[#allocation14_spill]] %s6246_s9  ;;  %p5426_p11 = por %p115_p6, %p90_p5 }
  0x2d   : > { %s72_s24 = ssub.s32 %s5272_s21, %s6246_s9  ;;  %p139_p12 = scmp.eq.s32.totalorder %s4439_s8, 35 }
  0x2e   : > { %s73_s11 = sor.u32 %s72_s24, %s71_s6  ;;  %p100_p13 = scmp.eq.s32.totalorder %s72_s24, 0 }
  0x2f   : > { %p74_p1 = scmp.eq.s32.totalorder %s73_s11, 0  ;;  %p5432_p3 = por %p139_p12, %p109_p0 }
  0x30   : > { %s5437_s28 = scalar_select %p100_p13, %s5244_s14, %s102_s4  }
  0x31   : > { %s6224_s27 = scalar_select %p5432_p3, 1, 0 }
  0x32   : > { %s6225_s29 = sadd.s32 1, %s5256_s17  ;;  %p145_p8 = scmp.eq.s32.totalorder %s4440_s7, 35 }
  0x33   : > { %s5442_s30 = scalar_select %p74_p1, %s5256_s17, %s6225_s29  }
  0x34   : > { %s197_s25 = sand.u32 1, %s5244_s14   ;;  %p111_p5 = por %p109_p0, %p84_p2 }
  0x35   : > { %s4448_s26 = sshll.u32 %s197_s25, 3  ;;  %p5450_p9 = por %p145_p8, %p115_p6 }
  0x36   : > { %s4980_s8 = sshll.u32 %s5272_s21, 7  ;;  %s201_s24 = scalar_lea.vmem [#allocation6], %s4448_s26 }
  0x37   : > { %s6226_s6 = scalar_select %p5450_p9, 1, 0 }
  0x38   : > { %s209_s11 = sshll.u32 %s201_s24, 4  ;;  %s207_s4 = scalar_lea.hbm %s6208_s2, %s4980_s8  ;;  %s210_s11 = int_to_ptr.vmem [resolvable:$true] %s209_s11 }
  0x39   : > { %p5460_p12 = pnand %p4999_p4, %p111_p5  ;;  %s198_s29 = scalar_lea.sflag [#allocation7], %s197_s25 }
  0x3a   : > { %s5137_s23 = scalar_lea.vmem %s210_s11, 128  ;;  %s5282_s26 = smov [#allocation6]  }
  0x3b   : > { %p5126_p2 = pneg %p5460_p12  ;;  %p5138_p6 = scmp.ne.s32.totalorder %s210_s11, %s5137_s23 }
  0x3c   : > { %s5142_s24 = sshll.u32 %s5282_s26, 4  ;;  %s5143_s24 = int_to_ptr.vmem [resolvable:$false] %s5142_s24 }
  0x3d   : > { %p5140_p0 = pnand %p5138_p6, %p5126_p2  ;;  %s5144_s21 = scalar_lea.vmem %s5143_s24, 256 }
  0x3e   : > { %p5145_p1 = scmp.lt.s32.totalorder %s210_s11, %s5143_s24  ;;  %p5146_p8 = scmp.lt.s32.totalorder %s5144_s21, %s5137_s23 }
  0x3f   : > { %p5141_p13 = pneg %p5140_p0 }
  0x40   : > { %p5147_p9 = por %p5146_p8, %p5145_p1 }
  0x42   : > { %p5148_p3 = pnand %p5147_p9, %p5141_p13 }
  0x44   : > { %5151 = shalt.err (!%p5148_p3)
}
  0x45   : > { %4994 = dma.hbm_to_vmem [thread:$0]  (!%p5460_p12), %s207_s4, 128, %s210_s11, %s198_s29  }
  0x46   : > { %218 = sbr.rel (%p5398_p7) target bundleno = 870 (0x366), region = 32  ;;  %s220_s1 = sand.u32 (!%p5398_p7), 1, %s5252_s16  }
  0x47   : > { %s4452_s9 = sshll.u32 (!%p5398_p7), %s220_s1, 12  ;;  %s221_s25 = scalar_lea.sflag (!%p5398_p7), [#allocation4], %s220_s1 }
  0x48   : > { %s5471_s8 = scalar_lea.vmem (!%p5398_p7), [#allocation3], %s4452_s9 }
  0x4b   : > { %5223 = dma.done.wait (%p5413_p10), %s221_s25, 65536  }
  0x4c   : > { %5225 = vsyncadd (%p5413_p10), %s221_s25, 4294901760  ;;  %s5478_s21 = sand.u32 1, %s5240_s13  }
  0x4d   : > { %s4453_s23 = sshll.u32 %s5478_s21, 3  ;;  %s230_s5 = scalar_lea.sflag [#allocation7], %s5478_s21 }
  0x4e   : > { %s5482_s11 = scalar_lea.vmem [#allocation6], %s4453_s23 }
  0x4f   : > { %5227 = dma.done.wait (%p5426_p11), %s230_s5, 128  }
  0x50   : > { %5229 = vsyncadd (%p5426_p11), %s230_s5, 4294967168  ;;  %s4455_s4 = sshll.u32 %s5260_s18, 3  ;;  %s5495_s26 = scalar_lea.vmem [#allocation8], %s4453_s23 }
  0x51   : > { %p266_p4 = scmp.lt.s32.totalorder %s4455_s4, 71  ;;  %p4456_p7 = scmp.ne.s32.totalorder %s5260_s18, 0 }
  0x53   : > { %s6248_s4 = smov (!%p266_p4, %s4455_s4), 71  ;;  %277 = sbr.rel (%p4456_p7) target bundleno = 90 (0x5a), region = 44 }
  0x54   : > { %s268_s29 = scalar_lea.vmem %s6206_s0, %s6248_s4 }
  0x58   : > { %v5283_v0 = vmov 0.0  }
  0x59   : > { %278 = vst [vmem:[#allocation2] sm:$0xff] %v5283_v0  ;;  %279 = vst [vmem:[#allocation2 + $0x8] sm:$0xff] %v5283_v0 }
  0x5a PF: > { %v339_v1 = vld [vmem:[%s5471_s8 + $0x1c0] sm:$0xff]  ;;  %v5284_v33 = vmov 1966171168   ;;  %v800_v35 = vlaneseq  ;;  %v282_v60 = vld [vmem:[%s268_s29] sm:$0xff]  ;;  %p4969_p10 = scmp.ne.s32.totalorder %s5260_s18, 8 }
  0x5b   : > { %v343_v2 = vld [vmem:[%s5471_s8 + $0x1e0] sm:$0xff]  ;;  %v798_v34 = vunpack.c.l.s4 %v5284_v33 }
  0x5c   : > { %v467_v3 = vld [vmem:[%s5471_s8 + $0x5c0] sm:$0xff]  ;;  %v4514_v4 = vcombine.high %v339_v1, %v343_v2  ;;  %v4513_v6 = vcombine.low %v339_v1, %v343_v2  ;;  %v5520_v45 = vshrl.u32 %v800_v35, 7 }
  0x5d   : > { %v471_v5 = vld [vmem:[%s5471_s8 + $0x5e0] sm:$0xff]  ;;  %v799_v44 = vunpack.c.0.s8 %v798_v34 }
  0x5e   : > { %v331_v7 = vld [vmem:[%s5471_s8 + $0x180] sm:$0xff]  ;;  %v4642_v9 = vcombine.high %v467_v3, %v471_v5  ;;  %v4641_v10 = vcombine.low %v467_v3, %v471_v5  ;;  %3413 = vmatprep.subr.bf16.mxu0 %v4514_v4 }
  0x5f   : > { %v335_v8 = vld [vmem:[%s5471_s8 + $0x1a0] sm:$0xff]  ;;  %3414 = vmatpush1.bf16.msra.mxu0 %v4513_v6  ;;  %v5527_v54 = vsub.s32 %v799_v44, %v5520_v45 }
  0x60   : > { %v4506_v11 = vcombine.high %v331_v7, %v335_v8  ;;  %v459_v12 = vld [vmem:[%s5471_s8 + $0x580] sm:$0xff]  ;;  %3454 = vmatprep.subr.bf16.mxu1 %v4642_v9  ;;  %v4505_v19 = vcombine.low %v331_v7, %v335_v8 }
  0x61   : > { %v463_v13 = vld [vmem:[%s5471_s8 + $0x5a0] sm:$0xff]  ;;  %3455 = vmatpush1.bf16.msra.mxu1 %v4641_v10  ;;  %v5539_v0 = vrot.slane %v282_v60, %v5527_v54 }
  0x62   : > { %v323_v14 = vld [vmem:[%s5471_s8 + $0x140] sm:$0xff]  ;;  %v4634_v15 = vcombine.high %v459_v12, %v463_v13  ;;  %3415 = vmatprep.subr.bf16.mxu0 %v4506_v11  ;;  %v4633_v20 = vcombine.low %v459_v12, %v463_v13 }
  0x63   : > { %v327_v16 = vld [vmem:[%s5471_s8 + $0x160] sm:$0xff]  ;;  %3416 = vmatpush1.bf16.msra.mxu0 %v4505_v19  ;;  %v811_v4 = vcombine.high %v5539_v0, %v5539_v0 }
  0x64   : > { %v451_v17 = vld [vmem:[%s5471_s8 + $0x540] sm:$0xff]  ;;  %v4498_v21 = vcombine.high %v323_v14, %v327_v16  ;;  %3456 = vmatprep.subr.bf16.mxu1 %v4634_v15  ;;  %v4497_v27 = vcombine.low %v323_v14, %v327_v16 }
  0x65   : > { %v455_v18 = vld [vmem:[%s5471_s8 + $0x560] sm:$0xff]  ;;  %3457 = vmatpush1.bf16.msra.mxu1 %v4633_v20  ;;  %v5548_v10 = vrot.slane %v811_v4, %v5527_v54  ;;  %v796_v20 = vcombine.high %v282_v60, %v282_v60 }
  0x66   : > { %v4626_v22 = vcombine.high %v451_v17, %v455_v18  ;;  %v315_v23 = vld [vmem:[%s5471_s8 + $0x100] sm:$0xff]  ;;  %3417 = vmatprep.subr.bf16.mxu0 %v4498_v21  ;;  %v4625_v28 = vcombine.low %v451_v17, %v455_v18 }
  0x67   : > { %v319_v24 = vld [vmem:[%s5471_s8 + $0x120] sm:$0xff]  ;;  %3418 = vmatpush1.bf16.msra.mxu0 %v4497_v27  ;;  %3445 = vmatprep.mubr.bf16.mxu0 %v5548_v10  ;;  %v5555_v14 = vcombine.high %v5548_v10, %v5548_v10 }
  0x68   : > { %v443_v25 = vld [vmem:[%s5471_s8 + $0x500] sm:$0xff]  ;;  %v4490_v29 = vcombine.high %v315_v23, %v319_v24  ;;  %3458 = vmatprep.subr.bf16.mxu1 %v4626_v22  ;;  %v4489_v38 = vcombine.low %v315_v23, %v319_v24 }
  0x69   : > { %v447_v26 = vld [vmem:[%s5471_s8 + $0x520] sm:$0xff]  ;;  %3459 = vmatpush1.bf16.msra.mxu1 %v4625_v28  ;;  %3486 = vmatprep.mubr.bf16.mxu1 %v5555_v14 }
  0x6a   : > { %v4618_v30 = vcombine.high %v443_v25, %v447_v26  ;;  %v307_v31 = vld [vmem:[%s5471_s8 + $0xc0] sm:$0xff]  ;;  %3419 = vmatprep.subr.bf16.mxu0 %v4490_v29  ;;  %v4617_v39 = vcombine.low %v443_v25, %v447_v26  ;;  %v5565_v29 = vrot.slane %v796_v20, %v5527_v54 }
  0x6b   : > { %v311_v32 = vld [vmem:[%s5471_s8 + $0xe0] sm:$0xff]  ;;  %3420 = vmatpush1.bf16.msra.mxu0 %v4489_v38 }
  0x6c   : > { %v435_v36 = vld [vmem:[%s5471_s8 + $0x4c0] sm:$0xff]  ;;  %v4482_v40 = vcombine.high %v307_v31, %v311_v32  ;;  %3460 = vmatprep.subr.bf16.mxu1 %v4618_v30  ;;  %v4481_v48 = vcombine.low %v307_v31, %v311_v32  ;;  %v5571_v33 = vrot.slane %v5565_v29, %v5527_v54 }
  0x6d   : > { %v439_v37 = vld [vmem:[%s5471_s8 + $0x4e0] sm:$0xff]  ;;  %3461 = vmatpush1.bf16.msra.mxu1 %v4617_v39 }
  0x6e   : > { %v4610_v41 = vcombine.high %v435_v36, %v439_v37  ;;  %v299_v42 = vld [vmem:[%s5471_s8 + $0x80] sm:$0xff]  ;;  %3421 = vmatprep.subr.bf16.mxu0 %v4482_v40  ;;  %v4609_v49 = vcombine.low %v435_v36, %v439_v37 }
  0x6f   : > { %v303_v43 = vld [vmem:[%s5471_s8 + $0xa0] sm:$0xff]  ;;  %3422 = vmatpush1.bf16.msra.mxu0 %v4481_v48 }
  0x70   : > { %v427_v46 = vld [vmem:[%s5471_s8 + $0x480] sm:$0xff]  ;;  %v4474_v50 = vcombine.high %v299_v42, %v303_v43  ;;  %3462 = vmatprep.subr.bf16.mxu1 %v4610_v41  ;;  %v4473_v57 = vcombine.low %v299_v42, %v303_v43 }
  0x71   : > { %v431_v47 = vld [vmem:[%s5471_s8 + $0x4a0] sm:$0xff]  ;;  %3463 = vmatpush1.bf16.msra.mxu1 %v4609_v49 }
  0x72   : > { %v4602_v51 = vcombine.high %v427_v46, %v431_v47  ;;  %v291_v52 = vld [vmem:[%s5471_s8 + $0x40] sm:$0xff]  ;;  %3423 = vmatprep.subr.bf16.mxu0 %v4474_v50  ;;  %v4601_v58 = vcombine.low %v427_v46, %v431_v47 }
  0x73   : > { %v295_v53 = vld [vmem:[%s5471_s8 + $0x60] sm:$0xff]  ;;  %3424 = vmatpush1.bf16.msra.mxu0 %v4473_v57 }
  0x74   : > { %v419_v55 = vld [vmem:[%s5471_s8 + $0x440] sm:$0xff]  ;;  %v4466_v59 = vcombine.high %v291_v52, %v295_v53  ;;  %3464 = vmatprep.subr.bf16.mxu1 %v4602_v51  ;;  %v4465_v3 = vcombine.low %v291_v52, %v295_v53 }
  0x75   : > { %v423_v56 = vld [vmem:[%s5471_s8 + $0x460] sm:$0xff]  ;;  %3465 = vmatpush1.bf16.msra.mxu1 %v4601_v58 }
  0x76   : > { %v4594_v61 = vcombine.high %v419_v55, %v423_v56  ;;  %v283_v62 = vld [vmem:[%s5471_s8] sm:$0xff]  ;;  %3425 = vmatprep.subr.bf16.mxu0 %v4466_v59  ;;  %v4593_v5 = vcombine.low %v419_v55, %v423_v56 }
  0x77   : > { %v287_v63 = vld [vmem:[%s5471_s8 + $0x20] sm:$0xff]  ;;  %3426 = vmatpush1.bf16.msra.mxu0 %v4465_v3 }
  0x78   : > { %v411_v1 = vld [vmem:[%s5471_s8 + $0x400] sm:$0xff]  ;;  %v4458_v6 = vcombine.high %v283_v62, %v287_v63  ;;  %3466 = vmatprep.subr.bf16.mxu1 %v4594_v61  ;;  %v4457_v13 = vcombine.low %v283_v62, %v287_v63 }
  0x79   : > { %v415_v2 = vld [vmem:[%s5471_s8 + $0x420] sm:$0xff]  ;;  %3467 = vmatpush1.bf16.msra.mxu1 %v4593_v5 }
  0x7a   : > { %v4586_v7 = vcombine.high %v411_v1, %v415_v2  ;;  %v403_v8 = vld [vmem:[%s5471_s8 + $0x3c0] sm:$0xff]  ;;  %3427 = vmatprep.subr.bf16.mxu0 %v4458_v6  ;;  %v4585_v15 = vcombine.low %v411_v1, %v415_v2 }
  0x7b   : > { %v407_v9 = vld [vmem:[%s5471_s8 + $0x3e0] sm:$0xff]  ;;  %3428 = vmatpush1.bf16.msra.mxu0 %v4457_v13 }
  0x7c   : > { %v531_v11 = vld [vmem:[%s5471_s8 + $0x7c0] sm:$0xff]  ;;  %v4578_v16 = vcombine.high %v403_v8, %v407_v9  ;;  %3468 = vmatprep.subr.bf16.mxu1 %v4586_v7  ;;  %v4577_v23 = vcombine.low %v403_v8, %v407_v9 }
  0x7d   : > { %v535_v12 = vld [vmem:[%s5471_s8 + $0x7e0] sm:$0xff]  ;;  %3469 = vmatpush1.bf16.msra.mxu1 %v4585_v15 }
  0x7e   : > { %v4706_v17 = vcombine.high %v531_v11, %v535_v12  ;;  %v395_v18 = vld [vmem:[%s5471_s8 + $0x380] sm:$0xff]  ;;  %3429 = vmatprep.subr.bf16.mxu0 %v4578_v16  ;;  %v4705_v24 = vcombine.low %v531_v11, %v535_v12 }
  0x7f   : > { %v399_v19 = vld [vmem:[%s5471_s8 + $0x3a0] sm:$0xff]  ;;  %3430 = vmatpush2.bf16.msra.mxu0 %v4577_v23 }
  0x80   : > { %v523_v21 = vld [vmem:[%s5471_s8 + $0x780] sm:$0xff]  ;;  %v4570_v25 = vcombine.high %v395_v18, %v399_v19  ;;  %3470 = vmatprep.subr.bf16.mxu1 %v4706_v17  ;;  %v4569_v32 = vcombine.low %v395_v18, %v399_v19 }
  0x81   : > { %v527_v22 = vld [vmem:[%s5471_s8 + $0x7a0] sm:$0xff]  ;;  %3471 = vmatpush2.bf16.msra.mxu1 %v4705_v24  ;;  %v5601_v24 = vrot.slane %v5539_v0, %v5527_v54 }
  0x82   : > { %v4698_v26 = vcombine.high %v523_v21, %v527_v22  ;;  %v387_v27 = vld [vmem:[%s5471_s8 + $0x340] sm:$0xff]  ;;  %3431 = vmatprep.subr.bf16.mxu0 %v4570_v25  ;;  %v4697_v34 = vcombine.low %v523_v21, %v527_v22  ;;  %v812_v22 = vcombine.high %v5565_v29, %v5565_v29 }
  0x83   : > { %v391_v28 = vld [vmem:[%s5471_s8 + $0x360] sm:$0xff]  ;;  %3432 = vmatpush2.bf16.msra.mxu0 %v4569_v32  ;;  %v5612_v0 = vcombine.high %v5601_v24, %v5601_v24 }
  0x84   : > { %v515_v30 = vld [vmem:[%s5471_s8 + $0x740] sm:$0xff]  ;;  %v4562_v35 = vcombine.high %v387_v27, %v391_v28  ;;  %3472 = vmatprep.subr.bf16.mxu1 %v4698_v26  ;;  %v4561_v41 = vcombine.low %v387_v27, %v391_v28  ;;  %v5608_v32 = vrot.slane %v812_v22, %v5527_v54 }
  0x85   : > { %v519_v31 = vld [vmem:[%s5471_s8 + $0x760] sm:$0xff]  ;;  %3473 = vmatpush2.bf16.msra.mxu1 %v4697_v34 }
  0x86   : > { %v4690_v36 = vcombine.high %v515_v30, %v519_v31  ;;  %v379_v37 = vld [vmem:[%s5471_s8 + $0x300] sm:$0xff]  ;;  %3433 = vmatprep.subr.bf16.mxu0 %v4562_v35  ;;  %v4689_v42 = vcombine.low %v515_v30, %v519_v31 }
  0x87   : > { %v383_v38 = vld [vmem:[%s5471_s8 + $0x320] sm:$0xff]  ;;  %3434 = vmatpush2.bf16.msra.mxu0 %v4561_v41 }
  0x88   : > { %v507_v39 = vld [vmem:[%s5471_s8 + $0x700] sm:$0xff]  ;;  %v4554_v43 = vcombine.high %v379_v37, %v383_v38  ;;  %3474 = vmatprep.subr.bf16.mxu1 %v4690_v36  ;;  %v4553_v50 = vcombine.low %v379_v37, %v383_v38 }
  0x89   : > { %v511_v40 = vld [vmem:[%s5471_s8 + $0x720] sm:$0xff]  ;;  %3475 = vmatpush2.bf16.msra.mxu1 %v4689_v42  ;;  %v5621_v42 = vcombine.high %v5608_v32, %v5608_v32 }
  0x8a   : > { %v4682_v44 = vcombine.high %v507_v39, %v511_v40  ;;  %v371_v46 = vld [vmem:[%s5471_s8 + $0x2c0] sm:$0xff]  ;;  %3435 = vmatprep.subr.bf16.mxu0 %v4554_v43  ;;  %v4681_v51 = vcombine.low %v507_v39, %v511_v40 }
  0x8b   : > { %v375_v47 = vld [vmem:[%s5471_s8 + $0x2e0] sm:$0xff]  ;;  %3436 = vmatpush2.bf16.msra.mxu0 %v4553_v50 }
  0x8c   : > { %v499_v48 = vld [vmem:[%s5471_s8 + $0x6c0] sm:$0xff]  ;;  %v4546_v52 = vcombine.high %v371_v46, %v375_v47  ;;  %3476 = vmatprep.subr.bf16.mxu1 %v4682_v44  ;;  %v4545_v59 = vcombine.low %v371_v46, %v375_v47 }
  0x8d   : > { %v503_v49 = vld [vmem:[%s5471_s8 + $0x6e0] sm:$0xff]  ;;  %3477 = vmatpush2.bf16.msra.mxu1 %v4681_v51 }
  0x8e   : > { %v4674_v53 = vcombine.high %v499_v48, %v503_v49  ;;  %v363_v55 = vld [vmem:[%s5471_s8 + $0x280] sm:$0xff]  ;;  %3437 = vmatprep.subr.bf16.mxu0 %v4546_v52  ;;  %v4673_v60 = vcombine.low %v499_v48, %v503_v49 }
  0x8f   : > { %v367_v56 = vld [vmem:[%s5471_s8 + $0x2a0] sm:$0xff]  ;;  %3438 = vmatpush2.bf16.msra.mxu0 %v4545_v59 }
  0x90   : > { %v491_v57 = vld [vmem:[%s5471_s8 + $0x680] sm:$0xff]  ;;  %v4538_v61 = vcombine.high %v363_v55, %v367_v56  ;;  %3478 = vmatprep.subr.bf16.mxu1 %v4674_v53  ;;  %v4537_v4 = vcombine.low %v363_v55, %v367_v56 }
  0x91   : > { %v495_v58 = vld [vmem:[%s5471_s8 + $0x6a0] sm:$0xff]  ;;  %3479 = vmatpush2.bf16.msra.mxu1 %v4673_v60 }
  0x92   : > { %v4666_v62 = vcombine.high %v491_v57, %v495_v58  ;;  %v355_v63 = vld [vmem:[%s5471_s8 + $0x240] sm:$0xff]  ;;  %3439 = vmatprep.subr.bf16.mxu0 %v4538_v61  ;;  %v4665_v5 = vcombine.low %v491_v57, %v495_v58 }
  0x93   : > { %v359_v1 = vld [vmem:[%s5471_s8 + $0x260] sm:$0xff]  ;;  %3440 = vmatpush2.bf16.msra.mxu0 %v4537_v4 }
  0x94   : > { %v483_v2 = vld [vmem:[%s5471_s8 + $0x640] sm:$0xff]  ;;  %v4530_v6 = vcombine.high %v355_v63, %v359_v1  ;;  %3480 = vmatprep.subr.bf16.mxu1 %v4666_v62  ;;  %v4529_v13 = vcombine.low %v355_v63, %v359_v1 }
  0x95   : > { %v487_v3 = vld [vmem:[%s5471_s8 + $0x660] sm:$0xff]  ;;  %3481 = vmatpush2.bf16.msra.mxu1 %v4665_v5 }
  0x96   : > { %v4658_v7 = vcombine.high %v483_v2, %v487_v3  ;;  %v347_v8 = vld [vmem:[%s5471_s8 + $0x200] sm:$0xff]  ;;  %3441 = vmatprep.subr.bf16.mxu0 %v4530_v6  ;;  %v4657_v15 = vcombine.low %v483_v2, %v487_v3 }
  0x97   : > { %v351_v9 = vld [vmem:[%s5471_s8 + $0x220] sm:$0xff]  ;;  %3442 = vmatpush2.bf16.msra.mxu0 %v4529_v13 }
  0x98   : > { %v475_v11 = vld [vmem:[%s5471_s8 + $0x600] sm:$0xff]  ;;  %v4522_v16 = vcombine.high %v347_v8, %v351_v9  ;;  %3482 = vmatprep.subr.bf16.mxu1 %v4658_v7  ;;  %v4521_v23 = vcombine.low %v347_v8, %v351_v9 }
  0x99   : > { %v479_v12 = vld [vmem:[%s5471_s8 + $0x620] sm:$0xff]  ;;  %3483 = vmatpush2.bf16.msra.mxu1 %v4657_v15 }
  0x9a   : > { %v4650_v17 = vcombine.high %v475_v11, %v479_v12  ;;  %v595_v18 = vld [vmem:[%s5471_s8 + $0x9c0] sm:$0xff]  ;;  %3443 = vmatprep.subr.bf16.mxu0 %v4522_v16  ;;  %v4649_v25 = vcombine.low %v475_v11, %v479_v12 }
  0x9b   : > { %v599_v19 = vld [vmem:[%s5471_s8 + $0x9e0] sm:$0xff]  ;;  %3444 = vmatpush2.bf16.msra.mxu0 %v4521_v23 }
  0x9c   : > { %v723_v20 = vld [vmem:[%s5471_s8 + $0xdc0] sm:$0xff]  ;;  %v4770_v26 = vcombine.high %v595_v18, %v599_v19  ;;  %3484 = vmatprep.subr.bf16.mxu1 %v4650_v17  ;;  %v4769_v34 = vcombine.low %v595_v18, %v599_v19 }
  0x9d   : > { %v727_v21 = vld [vmem:[%s5471_s8 + $0xde0] sm:$0xff]  ;;  %3485 = vmatpush2.bf16.msra.mxu1 %v4649_v25 }
  0x9e   : > { %v4898_v27 = vcombine.high %v723_v20, %v727_v21  ;;  %v587_v28 = vld [vmem:[%s5471_s8 + $0x980] sm:$0xff]  ;;  %3495 = vmatprep.subr.bf16.mxu0 %v4770_v26  ;;  %v4897_v35 = vcombine.low %v723_v20, %v727_v21  ;;  %3446 = vmatmul.mubr.bf16.vlgmr.msra.gmra.mxu0 %v5601_v24 }
  0x9f   : > { %v591_v30 = vld [vmem:[%s5471_s8 + $0x9a0] sm:$0xff]  ;;  %3496 = vmatpush1.bf16.msra.mxu0 %v4769_v34  ;;  %3527 = vmatprep.mubr.bf16.mxu0 %v5608_v32 }
  0xa0   : > { %v715_v31 = vld [vmem:[%s5471_s8 + $0xd80] sm:$0xff]  ;;  %v4762_v36 = vcombine.high %v587_v28, %v591_v30  ;;  %3536 = vmatprep.subr.bf16.mxu1 %v4898_v27  ;;  %3487 = vmatmul.mubr.bf16.vlgmr.msra.gmra.mxu1 %v5612_v0  ;;  %v4761_v43 = vcombine.low %v587_v28, %v591_v30 }
  0xa1   : > { %v719_v29 = vld [vmem:[%s5471_s8 + $0xda0] sm:$0xff]  ;;  %3537 = vmatpush1.bf16.msra.mxu1 %v4897_v35  ;;  %3568 = vmatprep.mubr.bf16.mxu1 %v5621_v42 }
  0xa2   : > { %v4890_v37 = vcombine.high %v715_v31, %v719_v29  ;;  %v579_v38 = vld [vmem:[%s5471_s8 + $0x940] sm:$0xff]  ;;  %3497 = vmatprep.subr.bf16.mxu0 %v4762_v36  ;;  %v4889_v44 = vcombine.low %v715_v31, %v719_v29 }
  0xa3   : > { %v583_v39 = vld [vmem:[%s5471_s8 + $0x960] sm:$0xff]  ;;  %3498 = vmatpush1.bf16.msra.mxu0 %v4761_v43 }
  0xa4   : > { %v707_v40 = vld [vmem:[%s5471_s8 + $0xd40] sm:$0xff]  ;;  %v4754_v46 = vcombine.high %v579_v38, %v583_v39  ;;  %3538 = vmatprep.subr.bf16.mxu1 %v4890_v37  ;;  %v4753_v52 = vcombine.low %v579_v38, %v583_v39 }
  0xa5   : > { %v711_v41 = vld [vmem:[%s5471_s8 + $0xd60] sm:$0xff]  ;;  %3539 = vmatpush1.bf16.msra.mxu1 %v4889_v44 }
  0xa6   : > { %v4882_v47 = vcombine.high %v707_v40, %v711_v41  ;;  %v571_v48 = vld [vmem:[%s5471_s8 + $0x900] sm:$0xff]  ;;  %3499 = vmatprep.subr.bf16.mxu0 %v4754_v46  ;;  %v4881_v53 = vcombine.low %v707_v40, %v711_v41 }
  0xa7   : > { %v575_v49 = vld [vmem:[%s5471_s8 + $0x920] sm:$0xff]  ;;  %3500 = vmatpush1.bf16.msra.mxu0 %v4753_v52 }
  0xa8   : > { %v699_v50 = vld [vmem:[%s5471_s8 + $0xd00] sm:$0xff]  ;;  %v4746_v55 = vcombine.high %v571_v48, %v575_v49  ;;  %3540 = vmatprep.subr.bf16.mxu1 %v4882_v47  ;;  %v4745_v61 = vcombine.low %v571_v48, %v575_v49 }
  0xa9   : > { %v703_v51 = vld [vmem:[%s5471_s8 + $0xd20] sm:$0xff]  ;;  %3541 = vmatpush1.bf16.msra.mxu1 %v4881_v53 }
  0xaa   : > { %v4874_v56 = vcombine.high %v699_v50, %v703_v51  ;;  %v563_v57 = vld [vmem:[%s5471_s8 + $0x8c0] sm:$0xff]  ;;  %3501 = vmatprep.subr.bf16.mxu0 %v4746_v55  ;;  %v4873_v62 = vcombine.low %v699_v50, %v703_v51 }
  0xab   : > { %v567_v58 = vld [vmem:[%s5471_s8 + $0x8e0] sm:$0xff]  ;;  %3502 = vmatpush1.bf16.msra.mxu0 %v4745_v61 }
  0xac   : > { %v691_v59 = vld [vmem:[%s5471_s8 + $0xcc0] sm:$0xff]  ;;  %v4738_v63 = vcombine.high %v563_v57, %v567_v58  ;;  %3542 = vmatprep.subr.bf16.mxu1 %v4874_v56  ;;  %v4737_v6 = vcombine.low %v563_v57, %v567_v58 }
  0xad   : > { %v695_v60 = vld [vmem:[%s5471_s8 + $0xce0] sm:$0xff]  ;;  %3543 = vmatpush1.bf16.msra.mxu1 %v4873_v62 }
  0xae   : > { %v4866_v1 = vcombine.high %v691_v59, %v695_v60  ;;  %v555_v2 = vld [vmem:[%s5471_s8 + $0x880] sm:$0xff]  ;;  %3503 = vmatprep.subr.bf16.mxu0 %v4738_v63  ;;  %v4865_v7 = vcombine.low %v691_v59, %v695_v60 }
  0xaf   : > { %v559_v3 = vld [vmem:[%s5471_s8 + $0x8a0] sm:$0xff]  ;;  %3504 = vmatpush1.bf16.msra.mxu0 %v4737_v6 }
  0xb0   : > { %v683_v4 = vld [vmem:[%s5471_s8 + $0xc80] sm:$0xff]  ;;  %v4730_v8 = vcombine.high %v555_v2, %v559_v3  ;;  %3544 = vmatprep.subr.bf16.mxu1 %v4866_v1  ;;  %v4729_v16 = vcombine.low %v555_v2, %v559_v3 }
  0xb1   : > { %v687_v5 = vld [vmem:[%s5471_s8 + $0xca0] sm:$0xff]  ;;  %3545 = vmatpush1.bf16.msra.mxu1 %v4865_v7 }
  0xb2   : > { %v4858_v9 = vcombine.high %v683_v4, %v687_v5  ;;  %v547_v11 = vld [vmem:[%s5471_s8 + $0x840] sm:$0xff]  ;;  %3505 = vmatprep.subr.bf16.mxu0 %v4730_v8  ;;  %v4857_v17 = vcombine.low %v683_v4, %v687_v5 }
  0xb3   : > { %v551_v12 = vld [vmem:[%s5471_s8 + $0x860] sm:$0xff]  ;;  %3506 = vmatpush1.bf16.msra.mxu0 %v4729_v16 }
  0xb4   : > { %v675_v13 = vld [vmem:[%s5471_s8 + $0xc40] sm:$0xff]  ;;  %v4722_v18 = vcombine.high %v547_v11, %v551_v12  ;;  %3546 = vmatprep.subr.bf16.mxu1 %v4858_v9  ;;  %v4721_v25 = vcombine.low %v547_v11, %v551_v12 }
  0xb5   : > { %v679_v15 = vld [vmem:[%s5471_s8 + $0xc60] sm:$0xff]  ;;  %3547 = vmatpush1.bf16.msra.mxu1 %v4857_v17 }
  0xb6   : > { %v4850_v19 = vcombine.high %v675_v13, %v679_v15  ;;  %v539_v20 = vld [vmem:[%s5471_s8 + $0x800] sm:$0xff]  ;;  %3507 = vmatprep.subr.bf16.mxu0 %v4722_v18  ;;  %v4849_v26 = vcombine.low %v675_v13, %v679_v15 }
  0xb7   : > { %v543_v21 = vld [vmem:[%s5471_s8 + $0x820] sm:$0xff]  ;;  %3508 = vmatpush1.bf16.msra.mxu0 %v4721_v25 }
  0xb8   : > { %v667_v22 = vld [vmem:[%s5471_s8 + $0xc00] sm:$0xff]  ;;  %v4714_v27 = vcombine.high %v539_v20, %v543_v21  ;;  %3548 = vmatprep.subr.bf16.mxu1 %v4850_v19  ;;  %v4713_v35 = vcombine.low %v539_v20, %v543_v21 }
  0xb9   : > { %v671_v23 = vld [vmem:[%s5471_s8 + $0xc20] sm:$0xff]  ;;  %3549 = vmatpush1.bf16.msra.mxu1 %v4849_v26 }
  0xba   : > { %v4842_v28 = vcombine.high %v667_v22, %v671_v23  ;;  %v659_v30 = vld [vmem:[%s5471_s8 + $0xbc0] sm:$0xff]  ;;  %3509 = vmatprep.subr.bf16.mxu0 %v4714_v27  ;;  %v4841_v36 = vcombine.low %v667_v22, %v671_v23 }
  0xbb   : > { %v663_v31 = vld [vmem:[%s5471_s8 + $0xbe0] sm:$0xff]  ;;  %3510 = vmatpush1.bf16.msra.mxu0 %v4713_v35 }
  0xbc   : > { %v787_v29 = vld [vmem:[%s5471_s8 + $0xfc0] sm:$0xff]  ;;  %v4834_v37 = vcombine.high %v659_v30, %v663_v31  ;;  %3550 = vmatprep.subr.bf16.mxu1 %v4842_v28  ;;  %v4833_v44 = vcombine.low %v659_v30, %v663_v31 }
  0xbd   : > { %v791_v34 = vld [vmem:[%s5471_s8 + $0xfe0] sm:$0xff]  ;;  %3551 = vmatpush1.bf16.msra.mxu1 %v4841_v36 }
  0xbe   : > { %v4962_v38 = vcombine.high %v787_v29, %v791_v34  ;;  %v651_v39 = vld [vmem:[%s5471_s8 + $0xb80] sm:$0xff]  ;;  %3511 = vmatprep.subr.bf16.mxu0 %v4834_v37  ;;  %v4961_v46 = vcombine.low %v787_v29, %v791_v34 }
  0xbf   : > { %v655_v40 = vld [vmem:[%s5471_s8 + $0xba0] sm:$0xff]  ;;  %3512 = vmatpush2.bf16.msra.mxu0 %v4833_v44  ;;  %v472_v44 = vld [vmem:[%s5471_s8 + $0x5e8] sm:$0xff] }
  0xc0   : > { %v779_v41 = vld [vmem:[%s5471_s8 + $0xf80] sm:$0xff]  ;;  %v4826_v47 = vcombine.high %v651_v39, %v655_v40  ;;  %3552 = vmatprep.subr.bf16.mxu1 %v4962_v38  ;;  %v4825_v53 = vcombine.low %v651_v39, %v655_v40  ;;  %v340_v40 = vld [vmem:[%s5471_s8 + $0x1c8] sm:$0xff] }
  0xc1   : > { %v783_v43 = vld [vmem:[%s5471_s8 + $0xfa0] sm:$0xff]  ;;  %3553 = vmatpush2.bf16.msra.mxu1 %v4961_v46 }
  0xc2   : > { %v4954_v48 = vcombine.high %v779_v41, %v783_v43  ;;  %v643_v49 = vld [vmem:[%s5471_s8 + $0xb40] sm:$0xff]  ;;  %3513 = vmatprep.subr.bf16.mxu0 %v4826_v47  ;;  %v4953_v55 = vcombine.low %v779_v41, %v783_v43  ;;  %v344_v41 = vld [vmem:[%s5471_s8 + $0x1e8] sm:$0xff] }
  0xc3   : > { %v647_v50 = vld [vmem:[%s5471_s8 + $0xb60] sm:$0xff]  ;;  %3514 = vmatpush2.bf16.msra.mxu0 %v4825_v53  ;;  %v468_v43 = vld [vmem:[%s5471_s8 + $0x5c8] sm:$0xff] }
  0xc4   : > { %v771_v51 = vld [vmem:[%s5471_s8 + $0xf40] sm:$0xff]  ;;  %v4818_v56 = vcombine.high %v643_v49, %v647_v50  ;;  %3554 = vmatprep.subr.bf16.mxu1 %v4954_v48  ;;  %v4817_v62 = vcombine.low %v643_v49, %v647_v50  ;;  %v4516_v48 = vcombine.high %v340_v40, %v344_v41  ;;  %v4644_v49 = vcombine.high %v468_v43, %v472_v44  ;;  %v332_v50 = vld [vmem:[%s5471_s8 + $0x188] sm:$0xff] }
  0xc5   : > { %v775_v52 = vld [vmem:[%s5471_s8 + $0xf60] sm:$0xff]  ;;  %3555 = vmatpush2.bf16.msra.mxu1 %v4953_v55  ;;  %v464_v53 = vld [vmem:[%s5471_s8 + $0x5a8] sm:$0xff]  ;;  %v5688_v55 = vcombine.high %v5571_v33, %v5571_v33 }
  0xc6   : > { %v4946_v57 = vcombine.high %v771_v51, %v775_v52  ;;  %v635_v58 = vld [vmem:[%s5471_s8 + $0xb00] sm:$0xff]  ;;  %3515 = vmatprep.subr.bf16.mxu0 %v4818_v56  ;;  %v4945_v63 = vcombine.low %v771_v51, %v775_v52  ;;  %v336_v51 = vld [vmem:[%s5471_s8 + $0x1a8] sm:$0xff]  ;;  %v4515_v56 = vcombine.low %v340_v40, %v344_v41 }
  0xc7   : > { %v639_v59 = vld [vmem:[%s5471_s8 + $0xb20] sm:$0xff]  ;;  %3516 = vmatpush2.bf16.msra.mxu0 %v4817_v62  ;;  %v460_v52 = vld [vmem:[%s5471_s8 + $0x588] sm:$0xff] }
  0xc8   : > { %v763_v60 = vld [vmem:[%s5471_s8 + $0xf00] sm:$0xff]  ;;  %v4810_v1 = vcombine.high %v635_v58, %v639_v59  ;;  %3556 = vmatprep.subr.bf16.mxu1 %v4946_v57  ;;  %v4809_v7 = vcombine.low %v635_v58, %v639_v59  ;;  %v4643_v57 = vcombine.low %v468_v43, %v472_v44  ;;  %v4508_v58 = vcombine.high %v332_v50, %v336_v51  ;;  %v452_v62 = vld [vmem:[%s5471_s8 + $0x548] sm:$0xff] }
  0xc9   : > { %v767_v61 = vld [vmem:[%s5471_s8 + $0xf20] sm:$0xff]  ;;  %3557 = vmatpush2.bf16.msra.mxu1 %v4945_v63  ;;  %v4636_v59 = vcombine.high %v460_v52, %v464_v53  ;;  %v456_v63 = vld [vmem:[%s5471_s8 + $0x568] sm:$0xff] }
  0xca   : > { %v4938_v2 = vcombine.high %v763_v60, %v767_v61  ;;  %v627_v3 = vld [vmem:[%s5471_s8 + $0xac0] sm:$0xff]  ;;  %3517 = vmatprep.subr.bf16.mxu0 %v4810_v1  ;;  %v4937_v8 = vcombine.low %v763_v60, %v767_v61  ;;  %v324_v60 = vld [vmem:[%s5471_s8 + $0x148] sm:$0xff]  ;;  %v4507_v1 = vcombine.low %v332_v50, %v336_v51 }
  0xcb   : > { %v631_v4 = vld [vmem:[%s5471_s8 + $0xae0] sm:$0xff]  ;;  %3518 = vmatpush2.bf16.msra.mxu0 %v4809_v7  ;;  %v328_v61 = vld [vmem:[%s5471_s8 + $0x168] sm:$0xff] }
  0xcc   : > { %v755_v5 = vld [vmem:[%s5471_s8 + $0xec0] sm:$0xff]  ;;  %v4802_v9 = vcombine.high %v627_v3, %v631_v4  ;;  %3558 = vmatprep.subr.bf16.mxu1 %v4938_v2  ;;  %v4801_v17 = vcombine.low %v627_v3, %v631_v4  ;;  %v4635_v2 = vcombine.low %v460_v52, %v464_v53  ;;  %v4500_v3 = vcombine.high %v324_v60, %v328_v61  ;;  %v444_v7 = vld [vmem:[%s5471_s8 + $0x508] sm:$0xff] }
  0xcd   : > { %v759_v6 = vld [vmem:[%s5471_s8 + $0xee0] sm:$0xff]  ;;  %3559 = vmatpush2.bf16.msra.mxu1 %v4937_v8  ;;  %v4628_v4 = vcombine.high %v452_v62, %v456_v63  ;;  %v448_v8 = vld [vmem:[%s5471_s8 + $0x528] sm:$0xff] }
  0xce   : > { %v4930_v11 = vcombine.high %v755_v5, %v759_v6  ;;  %v619_v12 = vld [vmem:[%s5471_s8 + $0xa80] sm:$0xff]  ;;  %3519 = vmatprep.subr.bf16.mxu0 %v4802_v9  ;;  %v4929_v18 = vcombine.low %v755_v5, %v759_v6  ;;  %v316_v5 = vld [vmem:[%s5471_s8 + $0x108] sm:$0xff]  ;;  %v4499_v9 = vcombine.low %v324_v60, %v328_v61 }
  0xcf   : > { %v623_v13 = vld [vmem:[%s5471_s8 + $0xaa0] sm:$0xff]  ;;  %3520 = vmatpush2.bf16.msra.mxu0 %v4801_v17  ;;  %v320_v6 = vld [vmem:[%s5471_s8 + $0x128] sm:$0xff] }
  0xd0   : > { %v747_v15 = vld [vmem:[%s5471_s8 + $0xe80] sm:$0xff]  ;;  %v4794_v19 = vcombine.high %v619_v12, %v623_v13  ;;  %3560 = vmatprep.subr.bf16.mxu1 %v4930_v11  ;;  %v4793_v26 = vcombine.low %v619_v12, %v623_v13  ;;  %v4627_v11 = vcombine.low %v452_v62, %v456_v63  ;;  %v4492_v12 = vcombine.high %v316_v5, %v320_v6  ;;  %v436_v17 = vld [vmem:[%s5471_s8 + $0x4c8] sm:$0xff] }
  0xd1   : > { %v751_v16 = vld [vmem:[%s5471_s8 + $0xea0] sm:$0xff]  ;;  %3561 = vmatpush2.bf16.msra.mxu1 %v4929_v18  ;;  %v4620_v13 = vcombine.high %v444_v7, %v448_v8  ;;  %v440_v18 = vld [vmem:[%s5471_s8 + $0x4e8] sm:$0xff] }
  0xd2   : > { %v4922_v20 = vcombine.high %v747_v15, %v751_v16  ;;  %v611_v21 = vld [vmem:[%s5471_s8 + $0xa40] sm:$0xff]  ;;  %3521 = vmatprep.subr.bf16.mxu0 %v4794_v19  ;;  %v4921_v27 = vcombine.low %v747_v15, %v751_v16  ;;  %v308_v15 = vld [vmem:[%s5471_s8 + $0xc8] sm:$0xff]  ;;  %v4491_v19 = vcombine.low %v316_v5, %v320_v6 }
  0xd3   : > { %v615_v22 = vld [vmem:[%s5471_s8 + $0xa60] sm:$0xff]  ;;  %3522 = vmatpush2.bf16.msra.mxu0 %v4793_v26  ;;  %v312_v16 = vld [vmem:[%s5471_s8 + $0xe8] sm:$0xff] }
  0xd4   : > { %v739_v23 = vld [vmem:[%s5471_s8 + $0xe40] sm:$0xff]  ;;  %v4786_v28 = vcombine.high %v611_v21, %v615_v22  ;;  %3562 = vmatprep.subr.bf16.mxu1 %v4922_v20  ;;  %v4785_v36 = vcombine.low %v611_v21, %v615_v22  ;;  %v4619_v20 = vcombine.low %v444_v7, %v448_v8  ;;  %v4484_v21 = vcombine.high %v308_v15, %v312_v16  ;;  %v428_v26 = vld [vmem:[%s5471_s8 + $0x488] sm:$0xff] }
  0xd5   : > { %v743_v25 = vld [vmem:[%s5471_s8 + $0xe60] sm:$0xff]  ;;  %3563 = vmatpush2.bf16.msra.mxu1 %v4921_v27  ;;  %v4612_v22 = vcombine.high %v436_v17, %v440_v18  ;;  %v432_v27 = vld [vmem:[%s5471_s8 + $0x4a8] sm:$0xff] }
  0xd6   : > { %v4914_v30 = vcombine.high %v739_v23, %v743_v25  ;;  %v603_v31 = vld [vmem:[%s5471_s8 + $0xa00] sm:$0xff]  ;;  %3523 = vmatprep.subr.bf16.mxu0 %v4786_v28  ;;  %v4913_v37 = vcombine.low %v739_v23, %v743_v25  ;;  %v300_v23 = vld [vmem:[%s5471_s8 + $0x88] sm:$0xff]  ;;  %v4483_v28 = vcombine.low %v308_v15, %v312_v16 }
  0xd7   : > { %v607_v29 = vld [vmem:[%s5471_s8 + $0xa20] sm:$0xff]  ;;  %3524 = vmatpush2.bf16.msra.mxu0 %v4785_v36  ;;  %v304_v25 = vld [vmem:[%s5471_s8 + $0xa8] sm:$0xff] }
  0xd8   : > { %v731_v34 = vld [vmem:[%s5471_s8 + $0xe00] sm:$0xff]  ;;  %v4778_v38 = vcombine.high %v603_v31, %v607_v29  ;;  %3564 = vmatprep.subr.bf16.mxu1 %v4914_v30  ;;  %v4777_v46 = vcombine.low %v603_v31, %v607_v29  ;;  %v4611_v30 = vcombine.low %v436_v17, %v440_v18  ;;  %v4476_v31 = vcombine.high %v300_v23, %v304_v25  ;;  %v420_v36 = vld [vmem:[%s5471_s8 + $0x448] sm:$0xff] }
  0xd9   : > { %v735_v35 = vld [vmem:[%s5471_s8 + $0xe20] sm:$0xff]  ;;  %3565 = vmatpush2.bf16.msra.mxu1 %v4913_v37  ;;  %v4604_v29 = vcombine.high %v428_v26, %v432_v27  ;;  %v424_v37 = vld [vmem:[%s5471_s8 + $0x468] sm:$0xff] }
  0xda   : > { %v4906_v39 = vcombine.high %v731_v34, %v735_v35  ;;  %3525 = vmatprep.subr.bf16.mxu0 %v4778_v38  ;;  %v4905_v47 = vcombine.low %v731_v34, %v735_v35  ;;  %v292_v34 = vld [vmem:[%s5471_s8 + $0x48] sm:$0xff]  ;;  %v4475_v38 = vcombine.low %v300_v23, %v304_v25  ;;  %v4596_v41 = vcombine.high %v420_v36, %v424_v37 }
  0xdb   : > { %3526 = vmatpush2.bf16.msra.mxu0 %v4777_v46  ;;  %v296_v35 = vld [vmem:[%s5471_s8 + $0x68] sm:$0xff] }
  0xdc   : > { %3566 = vmatprep.subr.bf16.mxu1 %v4906_v39  ;;  %3577 = vmatprep.subr.bf16.mxu0 %v4516_v48  ;;  %v4603_v39 = vcombine.low %v428_v26, %v432_v27  ;;  %v4468_v40 = vcombine.high %v292_v34, %v296_v35  ;;  %v284_v43 = vld [vmem:[%s5471_s8 + $0x8] sm:$0xff]  ;;  %v4467_v48 = vcombine.low %v292_v34, %v296_v35 }
  0xdd   : > { %3567 = vmatpush2.bf16.msra.mxu1 %v4905_v47  ;;  %v288_v44 = vld [vmem:[%s5471_s8 + $0x28] sm:$0xff] }
  0xde   : > { %3618 = vmatprep.subr.bf16.mxu1 %v4644_v49  ;;  %3528 = vmatmul.mubr.bf16.vlgmr.msra.gmra.mxu0 %v5571_v33  ;;  %v412_v46 = vld [vmem:[%s5471_s8 + $0x408] sm:$0xff]  ;;  %v4595_v49 = vcombine.low %v420_v36, %v424_v37  ;;  %v4460_v50 = vcombine.high %v284_v43, %v288_v44 }
  0xdf   : > { %3578 = vmatpush1.bf16.msra.mxu0 %v4515_v56  ;;  %3609 = vmatprep.mubr.bf16.mxu0 %v5548_v10  ;;  %v416_v47 = vld [vmem:[%s5471_s8 + $0x428] sm:$0xff] }
  0xe0   : > { %3569 = vmatmul.mubr.bf16.vlgmr.msra.gmra.mxu1 %v5688_v55  ;;  %3579 = vmatprep.subr.bf16.mxu0 %v4508_v58  ;;  %v4588_v51 = vcombine.high %v412_v46, %v416_v47  ;;  %v404_v52 = vld [vmem:[%s5471_s8 + $0x3c8] sm:$0xff]  ;;  %v4459_v58 = vcombine.low %v284_v43, %v288_v44 }
  0xe1   : > { %3619 = vmatpush1.bf16.msra.mxu1 %v4643_v57  ;;  %3650 = vmatprep.mubr.bf16.mxu1 %v5555_v14  ;;  %v408_v53 = vld [vmem:[%s5471_s8 + $0x3e8] sm:$0xff] }
  0xe2   : > { %3620 = vmatprep.subr.bf16.mxu1 %v4636_v59  ;;  %v532_v56 = vld [vmem:[%s5471_s8 + $0x7c8] sm:$0xff]  ;;  %v4587_v59 = vcombine.low %v412_v46, %v416_v47  ;;  %v4580_v60 = vcombine.high %v404_v52, %v408_v53 }
  0xe3   : > { %3580 = vmatpush1.bf16.msra.mxu0 %v4507_v1  ;;  %v536_v57 = vld [vmem:[%s5471_s8 + $0x7e8] sm:$0xff] }
  0xe4   : > { %3581 = vmatprep.subr.bf16.mxu0 %v4500_v3  ;;  %v4708_v61 = vcombine.high %v532_v56, %v536_v57  ;;  %v396_v62 = vld [vmem:[%s5471_s8 + $0x388] sm:$0xff]  ;;  %v4579_v3 = vcombine.low %v404_v52, %v408_v53 }
  0xe5   : > { %3621 = vmatpush1.bf16.msra.mxu1 %v4635_v2  ;;  %v400_v63 = vld [vmem:[%s5471_s8 + $0x3a8] sm:$0xff] }
  0xe6   : > { %3622 = vmatprep.subr.bf16.mxu1 %v4628_v4  ;;  %v524_v1 = vld [vmem:[%s5471_s8 + $0x788] sm:$0xff]  ;;  %v4707_v4 = vcombine.low %v532_v56, %v536_v57  ;;  %v4572_v5 = vcombine.high %v396_v62, %v400_v63 }
  0xe7   : > { %3582 = vmatpush1.bf16.msra.mxu0 %v4499_v9  ;;  %v528_v2 = vld [vmem:[%s5471_s8 + $0x7a8] sm:$0xff] }
  0xe8   : > { %3583 = vmatprep.subr.bf16.mxu0 %v4492_v12  ;;  %v4700_v6 = vcombine.high %v524_v1, %v528_v2  ;;  %v388_v7 = vld [vmem:[%s5471_s8 + $0x348] sm:$0xff]  ;;  %v4571_v12 = vcombine.low %v396_v62, %v400_v63 }
  0xe9   : > { %3623 = vmatpush1.bf16.msra.mxu1 %v4627_v11  ;;  %v392_v8 = vld [vmem:[%s5471_s8 + $0x368] sm:$0xff] }
  0xea   : > { %3624 = vmatprep.subr.bf16.mxu1 %v4620_v13  ;;  %v516_v9 = vld [vmem:[%s5471_s8 + $0x748] sm:$0xff]  ;;  %v4699_v13 = vcombine.low %v524_v1, %v528_v2  ;;  %v4564_v15 = vcombine.high %v388_v7, %v392_v8 }
  0xeb   : > { %3584 = vmatpush1.bf16.msra.mxu0 %v4491_v19  ;;  %v520_v11 = vld [vmem:[%s5471_s8 + $0x768] sm:$0xff] }
  0xec   : > { %3585 = vmatprep.subr.bf16.mxu0 %v4484_v21  ;;  %v4692_v16 = vcombine.high %v516_v9, %v520_v11  ;;  %v380_v17 = vld [vmem:[%s5471_s8 + $0x308] sm:$0xff]  ;;  %v4563_v21 = vcombine.low %v388_v7, %v392_v8 }
  0xed   : > { %3625 = vmatpush1.bf16.msra.mxu1 %v4619_v20  ;;  %v384_v18 = vld [vmem:[%s5471_s8 + $0x328] sm:$0xff] }
  0xee   : > { %3626 = vmatprep.subr.bf16.mxu1 %v4612_v22  ;;  %v508_v19 = vld [vmem:[%s5471_s8 + $0x708] sm:$0xff]  ;;  %v4691_v22 = vcombine.low %v516_v9, %v520_v11  ;;  %v4556_v23 = vcombine.high %v380_v17, %v384_v18 }
  0xef   : > { %3586 = vmatpush1.bf16.msra.mxu0 %v4483_v28  ;;  %v512_v20 = vld [vmem:[%s5471_s8 + $0x728] sm:$0xff] }
  0xf0   : > { %3587 = vmatprep.subr.bf16.mxu0 %v4476_v31  ;;  %v4684_v25 = vcombine.high %v508_v19, %v512_v20  ;;  %v372_v26 = vld [vmem:[%s5471_s8 + $0x2c8] sm:$0xff]  ;;  %v4555_v31 = vcombine.low %v380_v17, %v384_v18 }
  0xf1   : > { %3627 = vmatpush1.bf16.msra.mxu1 %v4611_v30  ;;  %v376_v27 = vld [vmem:[%s5471_s8 + $0x2e8] sm:$0xff] }
  0xf2   : > { %3628 = vmatprep.subr.bf16.mxu1 %v4604_v29  ;;  %v500_v28 = vld [vmem:[%s5471_s8 + $0x6c8] sm:$0xff]  ;;  %v4683_v29 = vcombine.low %v508_v19, %v512_v20  ;;  %v4548_v34 = vcombine.high %v372_v26, %v376_v27 }
  0xf3   : > { %3588 = vmatpush1.bf16.msra.mxu0 %v4475_v38  ;;  %v504_v30 = vld [vmem:[%s5471_s8 + $0x6e8] sm:$0xff] }
  0xf4   : > { %3589 = vmatprep.subr.bf16.mxu0 %v4468_v40  ;;  %v4676_v35 = vcombine.high %v500_v28, %v504_v30  ;;  %v364_v36 = vld [vmem:[%s5471_s8 + $0x288] sm:$0xff]  ;;  %v4547_v40 = vcombine.low %v372_v26, %v376_v27 }
  0xf5   : > { %3629 = vmatpush1.bf16.msra.mxu1 %v4603_v39  ;;  %v368_v37 = vld [vmem:[%s5471_s8 + $0x2a8] sm:$0xff] }
  0xf6   : > { %3630 = vmatprep.subr.bf16.mxu1 %v4596_v41  ;;  %v492_v38 = vld [vmem:[%s5471_s8 + $0x688] sm:$0xff]  ;;  %v4675_v41 = vcombine.low %v500_v28, %v504_v30  ;;  %v4540_v43 = vcombine.high %v364_v36, %v368_v37 }
  0xf7   : > { %3590 = vmatpush1.bf16.msra.mxu0 %v4467_v48  ;;  %v496_v39 = vld [vmem:[%s5471_s8 + $0x6a8] sm:$0xff] }
  0xf8   : > { %3591 = vmatprep.subr.bf16.mxu0 %v4460_v50  ;;  %v4668_v44 = vcombine.high %v492_v38, %v496_v39  ;;  %v356_v46 = vld [vmem:[%s5471_s8 + $0x248] sm:$0xff]  ;;  %v4539_v50 = vcombine.low %v364_v36, %v368_v37 }
  0xf9   : > { %3631 = vmatpush1.bf16.msra.mxu1 %v4595_v49  ;;  %v360_v47 = vld [vmem:[%s5471_s8 + $0x268] sm:$0xff] }
  0xfa   : > { %3632 = vmatprep.subr.bf16.mxu1 %v4588_v51  ;;  %v484_v48 = vld [vmem:[%s5471_s8 + $0x648] sm:$0xff]  ;;  %v4667_v51 = vcombine.low %v492_v38, %v496_v39  ;;  %v4532_v52 = vcombine.high %v356_v46, %v360_v47 }
  0xfb   : > { %3592 = vmatpush1.bf16.msra.mxu0 %v4459_v58  ;;  %v488_v49 = vld [vmem:[%s5471_s8 + $0x668] sm:$0xff] }
  0xfc   : > { %3593 = vmatprep.subr.bf16.mxu0 %v4580_v60  ;;  %v4660_v53 = vcombine.high %v484_v48, %v488_v49  ;;  %v348_v56 = vld [vmem:[%s5471_s8 + $0x208] sm:$0xff]  ;;  %v4531_v60 = vcombine.low %v356_v46, %v360_v47 }
  0xfd   : > { %3633 = vmatpush1.bf16.msra.mxu1 %v4587_v59  ;;  %v352_v57 = vld [vmem:[%s5471_s8 + $0x228] sm:$0xff] }
  0xfe   : > { %3634 = vmatprep.subr.bf16.mxu1 %v4708_v61  ;;  %v476_v58 = vld [vmem:[%s5471_s8 + $0x608] sm:$0xff]  ;;  %v4659_v61 = vcombine.low %v484_v48, %v488_v49  ;;  %v4524_v62 = vcombine.high %v348_v56, %v352_v57 }
  0xff   : > { %3594 = vmatpush2.bf16.msra.mxu0 %v4579_v3  ;;  %v480_v59 = vld [vmem:[%s5471_s8 + $0x628] sm:$0xff] }
 0x100   : > { %3595 = vmatprep.subr.bf16.mxu0 %v4572_v5  ;;  %v4652_v63 = vcombine.high %v476_v58, %v480_v59  ;;  %v596_v1 = vld [vmem:[%s5471_s8 + $0x9c8] sm:$0xff]  ;;  %v4523_v5 = vcombine.low %v348_v56, %v352_v57 }
 0x101   : > { %3635 = vmatpush2.bf16.msra.mxu1 %v4707_v4  ;;  %v600_v2 = vld [vmem:[%s5471_s8 + $0x9e8] sm:$0xff] }
 0x102   : > { %3636 = vmatprep.subr.bf16.mxu1 %v4700_v6  ;;  %v724_v3 = vld [vmem:[%s5471_s8 + $0xdc8] sm:$0xff]  ;;  %v4651_v6 = vcombine.low %v476_v58, %v480_v59  ;;  %v4772_v7 = vcombine.high %v596_v1, %v600_v2 }
 0x103   : > { %3596 = vmatpush2.bf16.msra.mxu0 %v4571_v12  ;;  %v728_v4 = vld [vmem:[%s5471_s8 + $0xde8] sm:$0xff] }
 0x104   : > { %3597 = vmatprep.subr.bf16.mxu0 %v4564_v15  ;;  %v4900_v8 = vcombine.high %v724_v3, %v728_v4  ;;  %v588_v9 = vld [vmem:[%s5471_s8 + $0x988] sm:$0xff]  ;;  %v4771_v15 = vcombine.low %v596_v1, %v600_v2 }
 0x105   : > { %3637 = vmatpush2.bf16.msra.mxu1 %v4699_v13  ;;  %v592_v11 = vld [vmem:[%s5471_s8 + $0x9a8] sm:$0xff] }
 0x106   : > { %3638 = vmatprep.subr.bf16.mxu1 %v4692_v16  ;;  %v716_v12 = vld [vmem:[%s5471_s8 + $0xd88] sm:$0xff]  ;;  %v4899_v16 = vcombine.low %v724_v3, %v728_v4  ;;  %v4764_v17 = vcombine.high %v588_v9, %v592_v11 }
 0x107   : > { %3598 = vmatpush2.bf16.msra.mxu0 %v4563_v21  ;;  %v720_v13 = vld [vmem:[%s5471_s8 + $0xda8] sm:$0xff] }
 0x108   : > { %3599 = vmatprep.subr.bf16.mxu0 %v4556_v23  ;;  %v4892_v18 = vcombine.high %v716_v12, %v720_v13  ;;  %v580_v19 = vld [vmem:[%s5471_s8 + $0x948] sm:$0xff]  ;;  %v4763_v23 = vcombine.low %v588_v9, %v592_v11 }
 0x109   : > { %3639 = vmatpush2.bf16.msra.mxu1 %v4691_v22  ;;  %v584_v20 = vld [vmem:[%s5471_s8 + $0x968] sm:$0xff] }
 0x10a   : > { %3640 = vmatprep.subr.bf16.mxu1 %v4684_v25  ;;  %v708_v21 = vld [vmem:[%s5471_s8 + $0xd48] sm:$0xff]  ;;  %v4891_v25 = vcombine.low %v716_v12, %v720_v13  ;;  %v4756_v26 = vcombine.high %v580_v19, %v584_v20 }
 0x10b   : > { %3600 = vmatpush2.bf16.msra.mxu0 %v4555_v31  ;;  %v712_v22 = vld [vmem:[%s5471_s8 + $0xd68] sm:$0xff] }
 0x10c   : > { %3601 = vmatprep.subr.bf16.mxu0 %v4548_v34  ;;  %v4884_v27 = vcombine.high %v708_v21, %v712_v22  ;;  %v572_v28 = vld [vmem:[%s5471_s8 + $0x908] sm:$0xff]  ;;  %v4755_v34 = vcombine.low %v580_v19, %v584_v20 }
 0x10d   : > { %3641 = vmatpush2.bf16.msra.mxu1 %v4683_v29  ;;  %v576_v30 = vld [vmem:[%s5471_s8 + $0x928] sm:$0xff] }
 0x10e   : > { %3642 = vmatprep.subr.bf16.mxu1 %v4676_v35  ;;  %v700_v31 = vld [vmem:[%s5471_s8 + $0xd08] sm:$0xff]  ;;  %v4883_v35 = vcombine.low %v708_v21, %v712_v22  ;;  %v4748_v36 = vcombine.high %v572_v28, %v576_v30 }
 0x10f   : > { %3602 = vmatpush2.bf16.msra.mxu0 %v4547_v40  ;;  %v704_v29 = vld [vmem:[%s5471_s8 + $0xd28] sm:$0xff] }
 0x110   : > { %3603 = vmatprep.subr.bf16.mxu0 %v4540_v43  ;;  %v4876_v37 = vcombine.high %v700_v31, %v704_v29  ;;  %v564_v38 = vld [vmem:[%s5471_s8 + $0x8c8] sm:$0xff]  ;;  %v4747_v43 = vcombine.low %v572_v28, %v576_v30 }
 0x111   : > { %3643 = vmatpush2.bf16.msra.mxu1 %v4675_v41  ;;  %v568_v39 = vld [vmem:[%s5471_s8 + $0x8e8] sm:$0xff] }
 0x112   : > { %3644 = vmatprep.subr.bf16.mxu1 %v4668_v44  ;;  %v692_v40 = vld [vmem:[%s5471_s8 + $0xcc8] sm:$0xff]  ;;  %v4875_v44 = vcombine.low %v700_v31, %v704_v29  ;;  %v4740_v46 = vcombine.high %v564_v38, %v568_v39 }
 0x113   : > { %3604 = vmatpush2.bf16.msra.mxu0 %v4539_v50  ;;  %v696_v41 = vld [vmem:[%s5471_s8 + $0xce8] sm:$0xff] }
 0x114   : > { %3605 = vmatprep.subr.bf16.mxu0 %v4532_v52  ;;  %v4868_v47 = vcombine.high %v692_v40, %v696_v41  ;;  %v556_v48 = vld [vmem:[%s5471_s8 + $0x888] sm:$0xff]  ;;  %v4739_v52 = vcombine.low %v564_v38, %v568_v39 }
 0x115   : > { %3645 = vmatpush2.bf16.msra.mxu1 %v4667_v51  ;;  %v560_v49 = vld [vmem:[%s5471_s8 + $0x8a8] sm:$0xff] }
 0x116   : > { %3646 = vmatprep.subr.bf16.mxu1 %v4660_v53  ;;  %v684_v50 = vld [vmem:[%s5471_s8 + $0xc88] sm:$0xff]  ;;  %v4867_v53 = vcombine.low %v692_v40, %v696_v41  ;;  %v4732_v56 = vcombine.high %v556_v48, %v560_v49 }
 0x117   : > { %3606 = vmatpush2.bf16.msra.mxu0 %v4531_v60  ;;  %v688_v51 = vld [vmem:[%s5471_s8 + $0xca8] sm:$0xff] }
 0x118   : > { %3607 = vmatprep.subr.bf16.mxu0 %v4524_v62  ;;  %v4860_v57 = vcombine.high %v684_v50, %v688_v51  ;;  %v548_v58 = vld [vmem:[%s5471_s8 + $0x848] sm:$0xff]  ;;  %v4731_v62 = vcombine.low %v556_v48, %v560_v49 }
 0x119   : > { %3647 = vmatpush2.bf16.msra.mxu1 %v4659_v61  ;;  %v552_v59 = vld [vmem:[%s5471_s8 + $0x868] sm:$0xff] }
 0x11a   : > { %3648 = vmatprep.subr.bf16.mxu1 %v4652_v63  ;;  %v676_v60 = vld [vmem:[%s5471_s8 + $0xc48] sm:$0xff]  ;;  %v4859_v63 = vcombine.low %v684_v50, %v688_v51  ;;  %v4724_v1 = vcombine.high %v548_v58, %v552_v59 }
 0x11b   : > { %3608 = vmatpush2.bf16.msra.mxu0 %v4523_v5  ;;  %v680_v61 = vld [vmem:[%s5471_s8 + $0xc68] sm:$0xff] }
 0x11c   : > { %3659 = vmatprep.subr.bf16.mxu0 %v4772_v7  ;;  %v4852_v2 = vcombine.high %v676_v60, %v680_v61  ;;  %v540_v3 = vld [vmem:[%s5471_s8 + $0x808] sm:$0xff]  ;;  %v4723_v7 = vcombine.low %v548_v58, %v552_v59 }
 0x11d   : > { %3649 = vmatpush2.bf16.msra.mxu1 %v4651_v6  ;;  %v544_v4 = vld [vmem:[%s5471_s8 + $0x828] sm:$0xff] }
 0x11e   : > { %3700 = vmatprep.subr.bf16.mxu1 %v4900_v8  ;;  %3610 = vmatmul.mubr.bf16.vlgmr.msra.gmra.mxu0 %v5601_v24  ;;  %v668_v5 = vld [vmem:[%s5471_s8 + $0xc08] sm:$0xff]  ;;  %v4851_v8 = vcombine.low %v676_v60, %v680_v61  ;;  %v4716_v9 = vcombine.high %v540_v3, %v544_v4 }
 0x11f   : > { %3660 = vmatpush1.bf16.msra.mxu0 %v4771_v15  ;;  %3691 = vmatprep.mubr.bf16.mxu0 %v5608_v32  ;;  %v672_v6 = vld [vmem:[%s5471_s8 + $0xc28] sm:$0xff] }
 0x120   : > { %3651 = vmatmul.mubr.bf16.vlgmr.msra.gmra.mxu1 %v5612_v0  ;;  %3661 = vmatprep.subr.bf16.mxu0 %v4764_v17  ;;  %v4844_v11 = vcombine.high %v668_v5, %v672_v6  ;;  %v660_v12 = vld [vmem:[%s5471_s8 + $0xbc8] sm:$0xff]  ;;  %v4715_v17 = vcombine.low %v540_v3, %v544_v4 }
 0x121   : > { %3701 = vmatpush1.bf16.msra.mxu1 %v4899_v16  ;;  %3732 = vmatprep.mubr.bf16.mxu1 %v5621_v42  ;;  %v664_v13 = vld [vmem:[%s5471_s8 + $0xbe8] sm:$0xff] }
 0x122   : > { %3702 = vmatprep.subr.bf16.mxu1 %v4892_v18  ;;  %v788_v15 = vld [vmem:[%s5471_s8 + $0xfc8] sm:$0xff]  ;;  %v4843_v18 = vcombine.low %v668_v5, %v672_v6  ;;  %v4836_v19 = vcombine.high %v660_v12, %v664_v13 }
 0x123   : > { %3662 = vmatpush1.bf16.msra.mxu0 %v4763_v23  ;;  %v792_v16 = vld [vmem:[%s5471_s8 + $0xfe8] sm:$0xff] }
 0x124   : > { %3663 = vmatprep.subr.bf16.mxu0 %v4756_v26  ;;  %v4964_v20 = vcombine.high %v788_v15, %v792_v16  ;;  %v652_v21 = vld [vmem:[%s5471_s8 + $0xb88] sm:$0xff]  ;;  %v4835_v26 = vcombine.low %v660_v12, %v664_v13 }
 0x125   : > { %3703 = vmatpush1.bf16.msra.mxu1 %v4891_v25  ;;  %v656_v22 = vld [vmem:[%s5471_s8 + $0xba8] sm:$0xff] }
 0x126   : > { %3704 = vmatprep.subr.bf16.mxu1 %v4884_v27  ;;  %v780_v23 = vld [vmem:[%s5471_s8 + $0xf88] sm:$0xff]  ;;  %v4963_v27 = vcombine.low %v788_v15, %v792_v16  ;;  %v4828_v28 = vcombine.high %v652_v21, %v656_v22 }
 0x127   : > { %3664 = vmatpush1.bf16.msra.mxu0 %v4755_v34  ;;  %v784_v25 = vld [vmem:[%s5471_s8 + $0xfa8] sm:$0xff] }
 0x128   : > { %3665 = vmatprep.subr.bf16.mxu0 %v4748_v36  ;;  %v4956_v30 = vcombine.high %v780_v23, %v784_v25  ;;  %v644_v31 = vld [vmem:[%s5471_s8 + $0xb48] sm:$0xff]  ;;  %v4827_v36 = vcombine.low %v652_v21, %v656_v22 }
 0x129   : > { %3705 = vmatpush1.bf16.msra.mxu1 %v4883_v35  ;;  %v648_v29 = vld [vmem:[%s5471_s8 + $0xb68] sm:$0xff] }
 0x12a   : > { %3706 = vmatprep.subr.bf16.mxu1 %v4876_v37  ;;  %v772_v34 = vld [vmem:[%s5471_s8 + $0xf48] sm:$0xff]  ;;  %v4955_v37 = vcombine.low %v780_v23, %v784_v25  ;;  %v4820_v38 = vcombine.high %v644_v31, %v648_v29  ;;  %v341_v23 = vld [vmem:[%s5471_s8 + $0x1d0] sm:$0xff] }
 0x12b   : > { %3666 = vmatpush1.bf16.msra.mxu0 %v4747_v43  ;;  %v776_v35 = vld [vmem:[%s5471_s8 + $0xf68] sm:$0xff]  ;;  %v345_v25 = vld [vmem:[%s5471_s8 + $0x1f0] sm:$0xff] }
 0x12c   : > { %3667 = vmatprep.subr.bf16.mxu0 %v4740_v46  ;;  %v4948_v39 = vcombine.high %v772_v34, %v776_v35  ;;  %v636_v40 = vld [vmem:[%s5471_s8 + $0xb08] sm:$0xff]  ;;  %v4819_v46 = vcombine.low %v644_v31, %v648_v29  ;;  %v4518_v31 = vcombine.high %v341_v23, %v345_v25 }
 0x12d   : > { %3707 = vmatpush1.bf16.msra.mxu1 %v4875_v44  ;;  %v640_v41 = vld [vmem:[%s5471_s8 + $0xb28] sm:$0xff] }
 0x12e   : > { %3708 = vmatprep.subr.bf16.mxu1 %v4868_v47  ;;  %v764_v43 = vld [vmem:[%s5471_s8 + $0xf08] sm:$0xff]  ;;  %v4947_v47 = vcombine.low %v772_v34, %v776_v35  ;;  %v4812_v48 = vcombine.high %v636_v40, %v640_v41  ;;  %v333_v34 = vld [vmem:[%s5471_s8 + $0x190] sm:$0xff] }
 0x12f   : > { %3668 = vmatpush1.bf16.msra.mxu0 %v4739_v52  ;;  %v768_v44 = vld [vmem:[%s5471_s8 + $0xf28] sm:$0xff]  ;;  %v337_v35 = vld [vmem:[%s5471_s8 + $0x1b0] sm:$0xff] }
 0x130   : > { %3669 = vmatprep.subr.bf16.mxu0 %v4732_v56  ;;  %v4940_v49 = vcombine.high %v764_v43, %v768_v44  ;;  %v628_v50 = vld [vmem:[%s5471_s8 + $0xac8] sm:$0xff]  ;;  %v4811_v56 = vcombine.low %v636_v40, %v640_v41  ;;  %v4510_v40 = vcombine.high %v333_v34, %v337_v35 }
 0x131   : > { %3709 = vmatpush1.bf16.msra.mxu1 %v4867_v53  ;;  %v632_v51 = vld [vmem:[%s5471_s8 + $0xae8] sm:$0xff] }
 0x132   : > { %3710 = vmatprep.subr.bf16.mxu1 %v4860_v57  ;;  %v756_v52 = vld [vmem:[%s5471_s8 + $0xec8] sm:$0xff]  ;;  %v4939_v57 = vcombine.low %v764_v43, %v768_v44  ;;  %v4804_v58 = vcombine.high %v628_v50, %v632_v51  ;;  %v325_v43 = vld [vmem:[%s5471_s8 + $0x150] sm:$0xff] }
 0x133   : > { %3670 = vmatpush1.bf16.msra.mxu0 %v4731_v62  ;;  %v760_v53 = vld [vmem:[%s5471_s8 + $0xee8] sm:$0xff]  ;;  %v329_v44 = vld [vmem:[%s5471_s8 + $0x170] sm:$0xff] }
 0x134   : > { %3671 = vmatprep.subr.bf16.mxu0 %v4724_v1  ;;  %v4932_v59 = vcombine.high %v756_v52, %v760_v53  ;;  %v620_v60 = vld [vmem:[%s5471_s8 + $0xa88] sm:$0xff]  ;;  %v4803_v1 = vcombine.low %v628_v50, %v632_v51  ;;  %v4509_v50 = vcombine.low %v333_v34, %v337_v35 }
 0x135   : > { %3711 = vmatpush1.bf16.msra.mxu1 %v4859_v63  ;;  %v624_v61 = vld [vmem:[%s5471_s8 + $0xaa8] sm:$0xff] }
 0x136   : > { %3712 = vmatprep.subr.bf16.mxu1 %v4852_v2  ;;  %v748_v62 = vld [vmem:[%s5471_s8 + $0xe88] sm:$0xff]  ;;  %v4931_v2 = vcombine.low %v756_v52, %v760_v53  ;;  %v4796_v3 = vcombine.high %v620_v60, %v624_v61 }
 0x137   : > { %3672 = vmatpush1.bf16.msra.mxu0 %v4723_v7  ;;  %v752_v63 = vld [vmem:[%s5471_s8 + $0xea8] sm:$0xff] }
 0x138   : > { %3673 = vmatprep.subr.bf16.mxu0 %v4716_v9  ;;  %v4924_v4 = vcombine.high %v748_v62, %v752_v63  ;;  %v612_v5 = vld [vmem:[%s5471_s8 + $0xa48] sm:$0xff]  ;;  %v4795_v9 = vcombine.low %v620_v60, %v624_v61  ;;  %v321_v60 = vld [vmem:[%s5471_s8 + $0x130] sm:$0xff] }
 0x139   : > { %3713 = vmatpush1.bf16.msra.mxu1 %v4851_v8  ;;  %v616_v6 = vld [vmem:[%s5471_s8 + $0xa68] sm:$0xff] }
 0x13a   : > { %3714 = vmatprep.subr.bf16.mxu1 %v4844_v11  ;;  %v740_v7 = vld [vmem:[%s5471_s8 + $0xe48] sm:$0xff]  ;;  %v4923_v11 = vcombine.low %v748_v62, %v752_v63  ;;  %v4788_v12 = vcombine.high %v612_v5, %v616_v6  ;;  %v445_v63 = vld [vmem:[%s5471_s8 + $0x510] sm:$0xff] }
 0x13b   : > { %3674 = vmatpush1.bf16.msra.mxu0 %v4715_v17  ;;  %v744_v8 = vld [vmem:[%s5471_s8 + $0xe68] sm:$0xff] }
 0x13c   : > { %3675 = vmatprep.subr.bf16.mxu0 %v4836_v19  ;;  %v4916_v13 = vcombine.high %v740_v7, %v744_v8  ;;  %v604_v15 = vld [vmem:[%s5471_s8 + $0xa08] sm:$0xff]  ;;  %v4787_v19 = vcombine.low %v612_v5, %v616_v6 }
 0x13d   : > { %3715 = vmatpush1.bf16.msra.mxu1 %v4843_v18  ;;  %v608_v16 = vld [vmem:[%s5471_s8 + $0xa28] sm:$0xff] }
 0x13e   : > { %3716 = vmatprep.subr.bf16.mxu1 %v4964_v20  ;;  %v732_v17 = vld [vmem:[%s5471_s8 + $0xe08] sm:$0xff]  ;;  %v4915_v20 = vcombine.low %v740_v7, %v744_v8  ;;  %v4780_v21 = vcombine.high %v604_v15, %v608_v16 }
 0x13f   : > { %3676 = vmatpush2.bf16.msra.mxu0 %v4835_v26  ;;  %v736_v18 = vld [vmem:[%s5471_s8 + $0xe28] sm:$0xff]  ;;  %v469_v26 = vld [vmem:[%s5471_s8 + $0x5d0] sm:$0xff] }
 0x140   : > { %3677 = vmatprep.subr.bf16.mxu0 %v4828_v28  ;;  %v4908_v22 = vcombine.high %v732_v17, %v736_v18  ;;  %v4779_v28 = vcombine.low %v604_v15, %v608_v16 }
 0x141   : > { %3717 = vmatpush2.bf16.msra.mxu1 %v4963_v27  ;;  %v473_v27 = vld [vmem:[%s5471_s8 + $0x5f0] sm:$0xff] }
 0x142   : > { %3718 = vmatprep.subr.bf16.mxu1 %v4956_v30  ;;  %v4907_v30 = vcombine.low %v732_v17, %v736_v18  ;;  %v4646_v29 = vcombine.high %v469_v26, %v473_v27 }
 0x143   : > { %3678 = vmatpush2.bf16.msra.mxu0 %v4827_v36  ;;  %v461_v36 = vld [vmem:[%s5471_s8 + $0x590] sm:$0xff] }
 0x144   : > { %3679 = vmatprep.subr.bf16.mxu0 %v4820_v38  ;;  %v4517_v38 = vcombine.low %v341_v23, %v345_v25 }
 0x145   : > { %3719 = vmatpush2.bf16.msra.mxu1 %v4955_v37  ;;  %v465_v37 = vld [vmem:[%s5471_s8 + $0x5b0] sm:$0xff] }
 0x146   : > { %3720 = vmatprep.subr.bf16.mxu1 %v4948_v39  ;;  %v4645_v39 = vcombine.low %v469_v26, %v473_v27  ;;  %v4638_v41 = vcombine.high %v461_v36, %v465_v37  ;;  %v4637_v53 = vcombine.low %v461_v36, %v465_v37 }
 0x147   : > { %3680 = vmatpush2.bf16.msra.mxu0 %v4819_v46 }
 0x148   : > { %3681 = vmatprep.subr.bf16.mxu0 %v4812_v48  ;;  %v457_v48 = vld [vmem:[%s5471_s8 + $0x570] sm:$0xff] }
 0x149   : > { %3721 = vmatpush2.bf16.msra.mxu1 %v4947_v47  ;;  %v453_v47 = vld [vmem:[%s5471_s8 + $0x550] sm:$0xff] }
 0x14a   : > { %3722 = vmatprep.subr.bf16.mxu1 %v4940_v49  ;;  %v4629_v5 = vcombine.low %v453_v47, %v457_v48 }
 0x14b   : > { %3682 = vmatpush2.bf16.msra.mxu0 %v4811_v56  ;;  %v4502_v56 = vcombine.high %v325_v43, %v329_v44 }
 0x14c   : > { %3683 = vmatprep.subr.bf16.mxu0 %v4804_v58  ;;  %v4630_v58 = vcombine.high %v453_v47, %v457_v48  ;;  %v405_v48 = vld [vmem:[%s5471_s8 + $0x3d0] sm:$0xff] }
 0x14d   : > { %3723 = vmatpush2.bf16.msra.mxu1 %v4939_v57 }
 0x14e   : > { %3724 = vmatprep.subr.bf16.mxu1 %v4932_v59  ;;  %v317_v59 = vld [vmem:[%s5471_s8 + $0x110] sm:$0xff] }
 0x14f   : > { %3684 = vmatpush2.bf16.msra.mxu0 %v4803_v1  ;;  %v449_v1 = vld [vmem:[%s5471_s8 + $0x530] sm:$0xff]  ;;  %v4494_v6 = vcombine.high %v317_v59, %v321_v60  ;;  %v4493_v15 = vcombine.low %v317_v59, %v321_v60 }
 0x150   : > { %3685 = vmatprep.subr.bf16.mxu0 %v4796_v3  ;;  %v4501_v3 = vcombine.low %v325_v43, %v329_v44  ;;  %v4622_v8 = vcombine.high %v445_v63, %v449_v1  ;;  %v4621_v16 = vcombine.low %v445_v63, %v449_v1  ;;  %v397_v59 = vld [vmem:[%s5471_s8 + $0x390] sm:$0xff] }
 0x151   : > { %3725 = vmatpush2.bf16.msra.mxu1 %v4931_v2  ;;  %v401_v60 = vld [vmem:[%s5471_s8 + $0x3b0] sm:$0xff] }
 0x152   : > { %3726 = vmatprep.subr.bf16.mxu1 %v4924_v4  ;;  %v529_v63 = vld [vmem:[%s5471_s8 + $0x7b0] sm:$0xff] }
 0x153   : > { %3686 = vmatpush2.bf16.msra.mxu0 %v4795_v9  ;;  %v309_v9 = vld [vmem:[%s5471_s8 + $0xd0] sm:$0xff] }
 0x154   : > { %3687 = vmatprep.subr.bf16.mxu0 %v4788_v12  ;;  %v437_v12 = vld [vmem:[%s5471_s8 + $0x4d0] sm:$0xff] }
 0x155   : > { %3727 = vmatpush2.bf16.msra.mxu1 %v4923_v11  ;;  %v313_v11 = vld [vmem:[%s5471_s8 + $0xf0] sm:$0xff] }
 0x156   : > { %3728 = vmatprep.subr.bf16.mxu1 %v4916_v13  ;;  %v441_v13 = vld [vmem:[%s5471_s8 + $0x4f0] sm:$0xff]  ;;  %v4486_v17 = vcombine.high %v309_v9, %v313_v11  ;;  %v4485_v23 = vcombine.low %v309_v9, %v313_v11  ;;  %v4573_v9 = vcombine.low %v397_v59, %v401_v60 }
 0x157   : > { %3688 = vmatpush2.bf16.msra.mxu0 %v4787_v19  ;;  %v4614_v18 = vcombine.high %v437_v12, %v441_v13  ;;  %v301_v19 = vld [vmem:[%s5471_s8 + $0x90] sm:$0xff]  ;;  %v4613_v25 = vcombine.low %v437_v12, %v441_v13 }
 0x158   : > { %3689 = vmatprep.subr.bf16.mxu0 %v4780_v21  ;;  %v429_v21 = vld [vmem:[%s5471_s8 + $0x490] sm:$0xff] }
 0x159   : > { %3729 = vmatpush2.bf16.msra.mxu1 %v4915_v20  ;;  %v305_v20 = vld [vmem:[%s5471_s8 + $0xb0] sm:$0xff] }
 0x15a   : > { %3730 = vmatprep.subr.bf16.mxu1 %v4908_v22  ;;  %v433_v22 = vld [vmem:[%s5471_s8 + $0x4b0] sm:$0xff]  ;;  %v4478_v26 = vcombine.high %v301_v19, %v305_v20  ;;  %v4477_v34 = vcombine.low %v301_v19, %v305_v20 }
 0x15b   : > { %3690 = vmatpush2.bf16.msra.mxu0 %v4779_v28  ;;  %v4606_v27 = vcombine.high %v429_v21, %v433_v22  ;;  %v293_v28 = vld [vmem:[%s5471_s8 + $0x50] sm:$0xff]  ;;  %v4605_v35 = vcombine.low %v429_v21, %v433_v22 }
 0x15c   : > { %3741 = vmatprep.subr.bf16.mxu0 %v4518_v31  ;;  %v421_v31 = vld [vmem:[%s5471_s8 + $0x450] sm:$0xff] }
 0x15d   : > { %3731 = vmatpush2.bf16.msra.mxu1 %v4907_v30  ;;  %v297_v30 = vld [vmem:[%s5471_s8 + $0x70] sm:$0xff] }
 0x15e   : > { %3782 = vmatprep.subr.bf16.mxu1 %v4646_v29  ;;  %v3447_v46 = vpop.f32.mrf.mxu0  ;;  %3692 = vmatmul.mubr.bf16.vlgmr.msra.gmra.mxu0 %v5571_v33  ;;  %v425_v29 = vld [vmem:[%s5471_s8 + $0x470] sm:$0xff]  ;;  %v4470_v36 = vcombine.high %v293_v28, %v297_v30  ;;  %v4469_v43 = vcombine.low %v293_v28, %v297_v30 }
 0x15f   : > { %3742 = vmatpush1.bf16.msra.mxu0 %v4517_v38  ;;  %3773 = vmatprep.mubr.bf16.mxu0 %v5548_v10  ;;  %v4598_v37 = vcombine.high %v421_v31, %v425_v29  ;;  %v285_v38 = vld [vmem:[%s5471_s8 + $0x10] sm:$0xff]  ;;  %v4597_v44 = vcombine.low %v421_v31, %v425_v29 }
 0x160   : > { %v3488_v49 = vpop.f32.mrf.mxu1  ;;  %3733 = vmatmul.mubr.bf16.vlgmr.msra.gmra.mxu1 %v5688_v55  ;;  %v3449_v52 = vpop.f32.mrf.mxu0  ;;  %3743 = vmatprep.subr.bf16.mxu0 %v4510_v40  ;;  %v413_v40 = vld [vmem:[%s5471_s8 + $0x410] sm:$0xff] }
 0x161   : > { %v5832_v51 = vadd.f32 %v3488_v49, %v3447_v46  ;;  %3783 = vmatpush1.bf16.msra.mxu1 %v4645_v39  ;;  %3814 = vmatprep.mubr.bf16.mxu1 %v5555_v14  ;;  %v289_v39 = vld [vmem:[%s5471_s8 + $0x30] sm:$0xff] }
 0x162   : > { %v3490_v57 = vpop.f32.mrf.mxu1  ;;  %3784 = vmatprep.subr.bf16.mxu1 %v4638_v41  ;;  %v3451_v62 = vpop.f32.mrf.mxu0  ;;  %v417_v41 = vld [vmem:[%s5471_s8 + $0x430] sm:$0xff]  ;;  %v4462_v46 = vcombine.high %v285_v38, %v289_v39 }
 0x163   : > { %v5837_v61 = vadd.f32 %v3490_v57, %v3449_v52  ;;  %3744 = vmatpush1.bf16.msra.mxu0 %v4509_v50  ;;  %v4590_v47 = vcombine.high %v413_v40, %v417_v41  ;;  %v409_v49 = vld [vmem:[%s5471_s8 + $0x3f0] sm:$0xff] }
 0x164   : > { %v3492_v2 = vpop.f32.mrf.mxu1  ;;  %v3452_v4 = vpop.f32.mrf.mxu0  ;;  %3745 = vmatprep.subr.bf16.mxu0 %v4502_v56  ;;  %v533_v50 = vld [vmem:[%s5471_s8 + $0x7d0] sm:$0xff]  ;;  %v4589_v56 = vcombine.low %v413_v40, %v417_v41  ;;  %v4582_v57 = vcombine.high %v405_v48, %v409_v49  ;;  %v4581_v1 = vcombine.low %v405_v48, %v409_v49 }
 0x165   : > { %3785 = vmatpush1.bf16.msra.mxu1 %v4637_v53  ;;  %v537_v52 = vld [vmem:[%s5471_s8 + $0x7f0] sm:$0xff]  ;;  %v4461_v53 = vcombine.low %v285_v38, %v289_v39 }
 0x166   : > { %v3493_v7 = vpop.f32.mrf.mxu1  ;;  %3786 = vmatprep.subr.bf16.mxu1 %v4630_v58  ;;  %v4710_v58 = vcombine.high %v533_v50, %v537_v52  ;;  %v525_v62 = vld [vmem:[%s5471_s8 + $0x790] sm:$0xff]  ;;  %v4709_v2 = vcombine.low %v533_v50, %v537_v52 }
 0x167   : > { %3746 = vmatpush1.bf16.msra.mxu0 %v4501_v3  ;;  %v4574_v3 = vcombine.high %v397_v59, %v401_v60  ;;  %v4702_v4 = vcombine.high %v525_v62, %v529_v63  ;;  %v517_v7 = vld [vmem:[%s5471_s8 + $0x750] sm:$0xff]  ;;  %v4701_v11 = vcombine.low %v525_v62, %v529_v63 }
 0x168   : > { %3747 = vmatprep.subr.bf16.mxu0 %v4494_v6  ;;  %v393_v6 = vld [vmem:[%s5471_s8 + $0x370] sm:$0xff] }
 0x169   : > { %3787 = vmatpush1.bf16.msra.mxu1 %v4629_v5  ;;  %v389_v5 = vld [vmem:[%s5471_s8 + $0x350] sm:$0xff] }
 0x16a   : > { %3788 = vmatprep.subr.bf16.mxu1 %v4622_v8  ;;  %v521_v8 = vld [vmem:[%s5471_s8 + $0x770] sm:$0xff]  ;;  %v4566_v12 = vcombine.high %v389_v5, %v393_v6  ;;  %v4565_v19 = vcombine.low %v389_v5, %v393_v6 }
 0x16b   : > { %3748 = vmatpush1.bf16.msra.mxu0 %v4493_v15  ;;  %v4694_v13 = vcombine.high %v517_v7, %v521_v8  ;;  %v381_v15 = vld [vmem:[%s5471_s8 + $0x310] sm:$0xff]  ;;  %v4693_v20 = vcombine.low %v517_v7, %v521_v8 }
 0x16c   : > { %3749 = vmatprep.subr.bf16.mxu0 %v4486_v17  ;;  %v509_v17 = vld [vmem:[%s5471_s8 + $0x710] sm:$0xff] }
 0x16d   : > { %3789 = vmatpush1.bf16.msra.mxu1 %v4621_v16  ;;  %v385_v16 = vld [vmem:[%s5471_s8 + $0x330] sm:$0xff] }
 0x16e   : > { %3790 = vmatprep.subr.bf16.mxu1 %v4614_v18  ;;  %v513_v18 = vld [vmem:[%s5471_s8 + $0x730] sm:$0xff]  ;;  %v4558_v21 = vcombine.high %v381_v15, %v385_v16  ;;  %v4557_v28 = vcombine.low %v381_v15, %v385_v16 }
 0x16f   : > { %3750 = vmatpush1.bf16.msra.mxu0 %v4485_v23  ;;  %v4686_v22 = vcombine.high %v509_v17, %v513_v18  ;;  %v373_v23 = vld [vmem:[%s5471_s8 + $0x2d0] sm:$0xff]  ;;  %v4685_v30 = vcombine.low %v509_v17, %v513_v18 }
 0x170   : > { %3751 = vmatprep.subr.bf16.mxu0 %v4478_v26  ;;  %v501_v26 = vld [vmem:[%s5471_s8 + $0x6d0] sm:$0xff] }
 0x171   : > { %3791 = vmatpush1.bf16.msra.mxu1 %v4613_v25  ;;  %v377_v25 = vld [vmem:[%s5471_s8 + $0x2f0] sm:$0xff] }
 0x172   : > { %3792 = vmatprep.subr.bf16.mxu1 %v4606_v27  ;;  %v505_v27 = vld [vmem:[%s5471_s8 + $0x6f0] sm:$0xff]  ;;  %v4550_v31 = vcombine.high %v373_v23, %v377_v25  ;;  %v4549_v38 = vcombine.low %v373_v23, %v377_v25 }
 0x173   : > { %3752 = vmatpush1.bf16.msra.mxu0 %v4477_v34  ;;  %v4678_v29 = vcombine.high %v501_v26, %v505_v27  ;;  %v365_v34 = vld [vmem:[%s5471_s8 + $0x290] sm:$0xff]  ;;  %v4677_v39 = vcombine.low %v501_v26, %v505_v27 }
 0x174   : > { %3753 = vmatprep.subr.bf16.mxu0 %v4470_v36  ;;  %v493_v36 = vld [vmem:[%s5471_s8 + $0x690] sm:$0xff] }
 0x175   : > { %3793 = vmatpush1.bf16.msra.mxu1 %v4605_v35  ;;  %v369_v35 = vld [vmem:[%s5471_s8 + $0x2b0] sm:$0xff] }
 0x176   : > { %3794 = vmatprep.subr.bf16.mxu1 %v4598_v37  ;;  %v497_v37 = vld [vmem:[%s5471_s8 + $0x6b0] sm:$0xff]  ;;  %v4542_v40 = vcombine.high %v365_v34, %v369_v35  ;;  %v4541_v48 = vcombine.low %v365_v34, %v369_v35 }
 0x177   : > { %3754 = vmatpush1.bf16.msra.mxu0 %v4469_v43  ;;  %v4670_v41 = vcombine.high %v493_v36, %v497_v37  ;;  %v357_v43 = vld [vmem:[%s5471_s8 + $0x250] sm:$0xff]  ;;  %v4669_v49 = vcombine.low %v493_v36, %v497_v37 }
 0x178   : > { %3755 = vmatprep.subr.bf16.mxu0 %v4462_v46  ;;  %v485_v46 = vld [vmem:[%s5471_s8 + $0x650] sm:$0xff] }
 0x179   : > { %3795 = vmatpush1.bf16.msra.mxu1 %v4597_v44  ;;  %v361_v44 = vld [vmem:[%s5471_s8 + $0x270] sm:$0xff] }
 0x17a   : > { %3796 = vmatprep.subr.bf16.mxu1 %v4590_v47  ;;  %v489_v47 = vld [vmem:[%s5471_s8 + $0x670] sm:$0xff]  ;;  %v4534_v50 = vcombine.high %v357_v43, %v361_v44  ;;  %v4533_v59 = vcombine.low %v357_v43, %v361_v44 }
 0x17b   : > { %3756 = vmatpush1.bf16.msra.mxu0 %v4461_v53  ;;  %v4662_v52 = vcombine.high %v485_v46, %v489_v47  ;;  %v349_v53 = vld [vmem:[%s5471_s8 + $0x210] sm:$0xff]  ;;  %v4661_v60 = vcombine.low %v485_v46, %v489_v47 }
 0x17c   : > { %3757 = vmatprep.subr.bf16.mxu0 %v4582_v57  ;;  %v477_v57 = vld [vmem:[%s5471_s8 + $0x610] sm:$0xff] }
 0x17d   : > { %3797 = vmatpush1.bf16.msra.mxu1 %v4589_v56  ;;  %v353_v56 = vld [vmem:[%s5471_s8 + $0x230] sm:$0xff] }
 0x17e   : > { %3798 = vmatprep.subr.bf16.mxu1 %v4710_v58  ;;  %v481_v58 = vld [vmem:[%s5471_s8 + $0x630] sm:$0xff]  ;;  %v4526_v62 = vcombine.high %v349_v53, %v353_v56  ;;  %v4525_v5 = vcombine.low %v349_v53, %v353_v56 }
 0x17f   : > { %3758 = vmatpush2.bf16.msra.mxu0 %v4581_v1  ;;  %v4654_v63 = vcombine.high %v477_v57, %v481_v58  ;;  %v597_v1 = vld [vmem:[%s5471_s8 + $0x9d0] sm:$0xff]  ;;  %v4653_v6 = vcombine.low %v477_v57, %v481_v58 }
 0x180   : > { %3759 = vmatprep.subr.bf16.mxu0 %v4574_v3  ;;  %v725_v3 = vld [vmem:[%s5471_s8 + $0xdd0] sm:$0xff] }
 0x181   : > { %3799 = vmatpush2.bf16.msra.mxu1 %v4709_v2  ;;  %v601_v2 = vld [vmem:[%s5471_s8 + $0x9f0] sm:$0xff] }
 0x182   : > { %3800 = vmatprep.subr.bf16.mxu1 %v4702_v4  ;;  %v729_v4 = vld [vmem:[%s5471_s8 + $0xdf0] sm:$0xff]  ;;  %v4774_v7 = vcombine.high %v597_v1, %v601_v2  ;;  %v4773_v15 = vcombine.low %v597_v1, %v601_v2 }
 0x183   : > { %3760 = vmatpush2.bf16.msra.mxu0 %v4573_v9  ;;  %v4902_v8 = vcombine.high %v725_v3, %v729_v4  ;;  %v589_v9 = vld [vmem:[%s5471_s8 + $0x990] sm:$0xff]  ;;  %v4901_v16 = vcombine.low %v725_v3, %v729_v4 }
 0x184   : > { %3761 = vmatprep.subr.bf16.mxu0 %v4566_v12  ;;  %v717_v12 = vld [vmem:[%s5471_s8 + $0xd90] sm:$0xff] }
 0x185   : > { %3801 = vmatpush2.bf16.msra.mxu1 %v4701_v11  ;;  %v593_v11 = vld [vmem:[%s5471_s8 + $0x9b0] sm:$0xff] }
 0x186   : > { %3802 = vmatprep.subr.bf16.mxu1 %v4694_v13  ;;  %v721_v13 = vld [vmem:[%s5471_s8 + $0xdb0] sm:$0xff]  ;;  %v4766_v17 = vcombine.high %v589_v9, %v593_v11  ;;  %v4765_v27 = vcombine.low %v589_v9, %v593_v11 }
 0x187   : > { %3762 = vmatpush2.bf16.msra.mxu0 %v4565_v19  ;;  %v4894_v18 = vcombine.high %v717_v12, %v721_v13  ;;  %v581_v19 = vld [vmem:[%s5471_s8 + $0x950] sm:$0xff] }
 0x188   : > { %3763 = vmatprep.subr.bf16.mxu0 %v4558_v21  ;;  %v713_v23 = vld [vmem:[%s5471_s8 + $0xd70] sm:$0xff] }
 0x189   : > { %3803 = vmatpush2.bf16.msra.mxu1 %v4693_v20  ;;  %v585_v20 = vld [vmem:[%s5471_s8 + $0x970] sm:$0xff] }
 0x18a   : > { %3804 = vmatprep.subr.bf16.mxu1 %v4686_v22  ;;  %v709_v22 = vld [vmem:[%s5471_s8 + $0xd50] sm:$0xff] }
 0x18b   : > { %3764 = vmatpush2.bf16.msra.mxu0 %v4557_v28  ;;  %v573_v36 = vld [vmem:[%s5471_s8 + $0x910] sm:$0xff]  ;;  %v4885_v46 = vcombine.low %v709_v22, %v713_v23 }
 0x18c   : > { %3765 = vmatprep.subr.bf16.mxu0 %v4550_v31  ;;  %v4758_v31 = vcombine.high %v581_v19, %v585_v20  ;;  %v577_v37 = vld [vmem:[%s5471_s8 + $0x930] sm:$0xff] }
 0x18d   : > { %3805 = vmatpush2.bf16.msra.mxu1 %v4685_v30  ;;  %v4893_v30 = vcombine.low %v717_v12, %v721_v13  ;;  %v4750_v47 = vcombine.high %v573_v36, %v577_v37  ;;  %v569_v53 = vld [vmem:[%s5471_s8 + $0x8f0] sm:$0xff]  ;;  %v4749_v58 = vcombine.low %v573_v36, %v577_v37 }
 0x18e   : > { %3806 = vmatprep.subr.bf16.mxu1 %v4678_v29  ;;  %v693_v56 = vld [vmem:[%s5471_s8 + $0xcd0] sm:$0xff] }
 0x18f   : > { %3766 = vmatpush2.bf16.msra.mxu0 %v4549_v38  ;;  %v697_v57 = vld [vmem:[%s5471_s8 + $0xcf0] sm:$0xff] }
 0x190   : > { %3767 = vmatprep.subr.bf16.mxu0 %v4542_v40  ;;  %v705_v40 = vld [vmem:[%s5471_s8 + $0xd30] sm:$0xff] }
 0x191   : > { %3807 = vmatpush2.bf16.msra.mxu1 %v4677_v39  ;;  %v701_v39 = vld [vmem:[%s5471_s8 + $0xd10] sm:$0xff] }
 0x192   : > { %3808 = vmatprep.subr.bf16.mxu1 %v4670_v41  ;;  %v561_v1 = vld [vmem:[%s5471_s8 + $0x8b0] sm:$0xff] }
 0x193   : > { %3768 = vmatpush2.bf16.msra.mxu0 %v4541_v48  ;;  %v685_v2 = vld [vmem:[%s5471_s8 + $0xc90] sm:$0xff] }
 0x194   : > { %3769 = vmatprep.subr.bf16.mxu0 %v4534_v50  ;;  %v4878_v50 = vcombine.high %v701_v39, %v705_v40  ;;  %v689_v3 = vld [vmem:[%s5471_s8 + $0xcb0] sm:$0xff] }
 0x195   : > { %3809 = vmatpush2.bf16.msra.mxu1 %v4669_v49  ;;  %v553_v9 = vld [vmem:[%s5471_s8 + $0x870] sm:$0xff] }
 0x196   : > { %3810 = vmatprep.subr.bf16.mxu1 %v4662_v52  ;;  %v565_v52 = vld [vmem:[%s5471_s8 + $0x8d0] sm:$0xff] }
 0x197   : > { %3770 = vmatpush2.bf16.msra.mxu0 %v4533_v59  ;;  %v4877_v59 = vcombine.low %v701_v39, %v705_v40  ;;  %v4741_v4 = vcombine.low %v565_v52, %v569_v53  ;;  %v677_v11 = vld [vmem:[%s5471_s8 + $0xc50] sm:$0xff] }
 0x198   : > { %3771 = vmatprep.subr.bf16.mxu0 %v4526_v62  ;;  %v4870_v62 = vcombine.high %v693_v56, %v697_v57  ;;  %v681_v12 = vld [vmem:[%s5471_s8 + $0xc70] sm:$0xff] }
 0x199   : > { %3811 = vmatpush2.bf16.msra.mxu1 %v4661_v60  ;;  %v4742_v60 = vcombine.high %v565_v52, %v569_v53  ;;  %v653_v37 = vld [vmem:[%s5471_s8 + $0xb90] sm:$0xff] }
 0x19a   : > { %3812 = vmatprep.subr.bf16.mxu1 %v4654_v63  ;;  %v557_v63 = vld [vmem:[%s5471_s8 + $0x890] sm:$0xff] }
 0x19b   : > { %3772 = vmatpush2.bf16.msra.mxu0 %v4525_v5  ;;  %v4869_v5 = vcombine.low %v693_v56, %v697_v57  ;;  %v4733_v13 = vcombine.low %v557_v63, %v561_v1  ;;  %v781_v39 = vld [vmem:[%s5471_s8 + $0xf90] sm:$0xff] }
 0x19c   : > { %3823 = vmatprep.subr.bf16.mxu0 %v4774_v7  ;;  %v4862_v7 = vcombine.high %v685_v2, %v689_v3  ;;  %v785_v40 = vld [vmem:[%s5471_s8 + $0xfb0] sm:$0xff] }
 0x19d   : > { %3813 = vmatpush2.bf16.msra.mxu1 %v4653_v6  ;;  %v4734_v6 = vcombine.high %v557_v63, %v561_v1  ;;  %v777_v52 = vld [vmem:[%s5471_s8 + $0xf70] sm:$0xff]  ;;  %v4957_v56 = vcombine.low %v781_v39, %v785_v40 }
 0x19e   : > { %3864 = vmatprep.subr.bf16.mxu1 %v4902_v8  ;;  %v3529_v21 = vpop.f32.mrf.mxu0  ;;  %3774 = vmatmul.mubr.bf16.vlgmr.msra.gmra.mxu0 %v5601_v24  ;;  %v549_v8 = vld [vmem:[%s5471_s8 + $0x850] sm:$0xff] }
 0x19f   : > { %v3530_v25 = vadd.f32 %v3529_v21, %v5832_v51  ;;  %3824 = vmatpush1.bf16.msra.mxu0 %v4773_v15  ;;  %v4886_v51 = vcombine.high %v709_v22, %v713_v23  ;;  %3855 = vmatprep.mubr.bf16.mxu0 %v5608_v32  ;;  %v4861_v15 = vcombine.low %v685_v2, %v689_v3  ;;  %v673_v21 = vld [vmem:[%s5471_s8 + $0xc30] sm:$0xff] }
 0x1a0   : > { %v3570_v26 = vpop.f32.mrf.mxu1  ;;  %3815 = vmatmul.mubr.bf16.vlgmr.msra.gmra.mxu1 %v5612_v0  ;;  %v3531_v28 = vpop.f32.mrf.mxu0  ;;  %3825 = vmatprep.subr.bf16.mxu0 %v4766_v17  ;;  %v4854_v17 = vcombine.high %v677_v11, %v681_v12  ;;  %v4725_v22 = vcombine.low %v549_v8, %v553_v9  ;;  %v4853_v23 = vcombine.low %v677_v11, %v681_v12  ;;  %v769_v63 = vld [vmem:[%s5471_s8 + $0xf30] sm:$0xff] }
 0x1a1   : > { %3865 = vmatpush1.bf16.msra.mxu1 %v4901_v16  ;;  %v5905_v29 = vadd.f32 %v3570_v26, %v3530_v25  ;;  %v3532_v34 = vadd.f32 %v3531_v28, %v5837_v61  ;;  %3896 = vmatprep.mubr.bf16.mxu1 %v5621_v42  ;;  %v4757_v61 = vcombine.low %v581_v19, %v585_v20  ;;  %v545_v19 = vld [vmem:[%s5471_s8 + $0x830] sm:$0xff] }
 0x1a2   : > { %v3572_v35 = vpop.f32.mrf.mxu1  ;;  %3866 = vmatprep.subr.bf16.mxu1 %v4894_v18  ;;  %v3533_v38 = vpop.f32.mrf.mxu0  ;;  %v4726_v16 = vcombine.high %v549_v8, %v553_v9  ;;  %v541_v18 = vld [vmem:[%s5471_s8 + $0x810] sm:$0xff] }
 0x1a3   : > { %v5914_v41 = vadd.f32 %v3572_v35, %v3532_v34  ;;  %3826 = vmatpush1.bf16.msra.mxu0 %v4765_v27  ;;  %v669_v20 = vld [vmem:[%s5471_s8 + $0xc10] sm:$0xff]  ;;  %v4718_v25 = vcombine.high %v541_v18, %v545_v19  ;;  %v4717_v34 = vcombine.low %v541_v18, %v545_v19 }
 0x1a4   : > { %v3574_v43 = vpop.f32.mrf.mxu1  ;;  %v3534_v44 = vpop.f32.mrf.mxu0  ;;  %3827 = vmatprep.subr.bf16.mxu0 %v4758_v31  ;;  %v4846_v26 = vcombine.high %v669_v20, %v673_v21  ;;  %v661_v27 = vld [vmem:[%s5471_s8 + $0xbd0] sm:$0xff]  ;;  %v4845_v35 = vcombine.low %v669_v20, %v673_v21 }
 0x1a5   : > { %3867 = vmatpush1.bf16.msra.mxu1 %v4893_v30  ;;  %v4077_v48 = vcombine.low %v5905_v29, %v5914_v41  ;;  %v665_v28 = vld [vmem:[%s5471_s8 + $0xbf0] sm:$0xff]  ;;  %v686_v29 = vld [vmem:[%s5471_s8 + $0xc98] sm:$0xff] }
 0x1a6   : > { %v3575_v49 = vpop.f32.mrf.mxu1  ;;  %3868 = vmatprep.subr.bf16.mxu1 %v4886_v51  ;;  %v789_v30 = vld [vmem:[%s5471_s8 + $0xfd0] sm:$0xff]  ;;  %v4838_v51 = vcombine.high %v661_v27, %v665_v28  ;;  %v4837_v43 = vcombine.low %v661_v27, %v665_v28  ;;  %v690_v41 = vld [vmem:[%s5471_s8 + $0xcb8] sm:$0xff] }
 0x1a7   : > { %3828 = vmatpush1.bf16.msra.mxu0 %v4757_v61  ;;  %v793_v31 = vld [vmem:[%s5471_s8 + $0xff0] sm:$0xff] }
 0x1a8   : > { %3829 = vmatprep.subr.bf16.mxu0 %v4750_v47  ;;  %v4966_v36 = vcombine.high %v789_v30, %v793_v31  ;;  %v657_v38 = vld [vmem:[%s5471_s8 + $0xbb0] sm:$0xff]  ;;  %v4965_v61 = vcombine.low %v789_v30, %v793_v31 }
 0x1a9   : > { %3869 = vmatpush1.bf16.msra.mxu1 %v4885_v46  ;;  %v4830_v44 = vcombine.high %v653_v37, %v657_v38  ;;  %v4958_v46 = vcombine.high %v781_v39, %v785_v40  ;;  %v645_v47 = vld [vmem:[%s5471_s8 + $0xb50] sm:$0xff]  ;;  %v4829_v53 = vcombine.low %v653_v37, %v657_v38 }
 0x1aa   : > { %3870 = vmatprep.subr.bf16.mxu1 %v4878_v50  ;;  %v649_v49 = vld [vmem:[%s5471_s8 + $0xb70] sm:$0xff] }
 0x1ab   : > { %3830 = vmatpush1.bf16.msra.mxu0 %v4749_v58  ;;  %v773_v50 = vld [vmem:[%s5471_s8 + $0xf50] sm:$0xff]  ;;  %v4822_v57 = vcombine.high %v645_v47, %v649_v49  ;;  %v4821_v1 = vcombine.low %v645_v47, %v649_v49  ;;  %v474_v47 = vld [vmem:[%s5471_s8 + $0x5f8] sm:$0xff] }
 0x1ac   : > { %3831 = vmatprep.subr.bf16.mxu0 %v4742_v60  ;;  %v4950_v58 = vcombine.high %v773_v50, %v777_v52  ;;  %v641_v60 = vld [vmem:[%s5471_s8 + $0xb30] sm:$0xff]  ;;  %v4949_v2 = vcombine.low %v773_v50, %v777_v52 }
 0x1ad   : > { %3871 = vmatpush1.bf16.msra.mxu1 %v4877_v59  ;;  %v637_v59 = vld [vmem:[%s5471_s8 + $0xb10] sm:$0xff] }
 0x1ae   : > { %3872 = vmatprep.subr.bf16.mxu1 %v4870_v62  ;;  %v765_v62 = vld [vmem:[%s5471_s8 + $0xf10] sm:$0xff]  ;;  %v4814_v3 = vcombine.high %v637_v59, %v641_v60  ;;  %v4813_v9 = vcombine.low %v637_v59, %v641_v60  ;;  %v466_v59 = vld [vmem:[%s5471_s8 + $0x5b8] sm:$0xff] }
 0x1af   : > { %3832 = vmatpush1.bf16.msra.mxu0 %v4741_v4  ;;  %v4942_v4 = vcombine.high %v765_v62, %v769_v63  ;;  %v761_v8 = vld [vmem:[%s5471_s8 + $0xef0] sm:$0xff]  ;;  %v4941_v11 = vcombine.low %v765_v62, %v769_v63 }
 0x1b0   : > { %3833 = vmatprep.subr.bf16.mxu0 %v4734_v6  ;;  %v633_v6 = vld [vmem:[%s5471_s8 + $0xaf0] sm:$0xff] }
 0x1b1   : > { %3873 = vmatpush1.bf16.msra.mxu1 %v4869_v5  ;;  %v629_v5 = vld [vmem:[%s5471_s8 + $0xad0] sm:$0xff] }
 0x1b2   : > { %3874 = vmatprep.subr.bf16.mxu1 %v4862_v7  ;;  %v757_v7 = vld [vmem:[%s5471_s8 + $0xed0] sm:$0xff]  ;;  %v4806_v12 = vcombine.high %v629_v5, %v633_v6  ;;  %v4805_v19 = vcombine.low %v629_v5, %v633_v6  ;;  %v454_v5 = vld [vmem:[%s5471_s8 + $0x558] sm:$0xff] }
 0x1b3   : > { %3834 = vmatpush1.bf16.msra.mxu0 %v4733_v13  ;;  %v4934_v13 = vcombine.high %v757_v7, %v761_v8  ;;  %v753_v18 = vld [vmem:[%s5471_s8 + $0xeb0] sm:$0xff]  ;;  %v4933_v20 = vcombine.low %v757_v7, %v761_v8  ;;  %v458_v6 = vld [vmem:[%s5471_s8 + $0x578] sm:$0xff] }
 0x1b4   : > { %3835 = vmatprep.subr.bf16.mxu0 %v4726_v16  ;;  %v625_v16 = vld [vmem:[%s5471_s8 + $0xab0] sm:$0xff] }
 0x1b5   : > { %3875 = vmatpush1.bf16.msra.mxu1 %v4861_v15  ;;  %v621_v15 = vld [vmem:[%s5471_s8 + $0xa90] sm:$0xff] }
 0x1b6   : > { %3876 = vmatprep.subr.bf16.mxu1 %v4854_v17  ;;  %v749_v17 = vld [vmem:[%s5471_s8 + $0xe90] sm:$0xff]  ;;  %v4798_v21 = vcombine.high %v621_v15, %v625_v16  ;;  %v4797_v28 = vcombine.low %v621_v15, %v625_v16  ;;  %v4632_v15 = vcombine.high %v454_v5, %v458_v6  ;;  %v318_v16 = vld [vmem:[%s5471_s8 + $0x118] sm:$0xff] }
 0x1b7   : > { %3836 = vmatpush1.bf16.msra.mxu0 %v4725_v22  ;;  %v4926_v22 = vcombine.high %v749_v17, %v753_v18  ;;  %v745_v27 = vld [vmem:[%s5471_s8 + $0xe70] sm:$0xff]  ;;  %v4925_v30 = vcombine.low %v749_v17, %v753_v18  ;;  %v322_v17 = vld [vmem:[%s5471_s8 + $0x138] sm:$0xff] }
 0x1b8   : > { %3837 = vmatprep.subr.bf16.mxu0 %v4718_v25  ;;  %v617_v25 = vld [vmem:[%s5471_s8 + $0xa70] sm:$0xff] }
 0x1b9   : > { %3877 = vmatpush1.bf16.msra.mxu1 %v4853_v23  ;;  %v613_v23 = vld [vmem:[%s5471_s8 + $0xa50] sm:$0xff] }
 0x1ba   : > { %3878 = vmatprep.subr.bf16.mxu1 %v4846_v26  ;;  %v741_v26 = vld [vmem:[%s5471_s8 + $0xe50] sm:$0xff]  ;;  %v4790_v31 = vcombine.high %v613_v23, %v617_v25  ;;  %v4789_v38 = vcombine.low %v613_v23, %v617_v25  ;;  %v4631_v25 = vcombine.low %v454_v5, %v458_v6  ;;  %v406_v6 = vld [vmem:[%s5471_s8 + $0x3d8] sm:$0xff] }
 0x1bb   : > { %3838 = vmatpush1.bf16.msra.mxu0 %v4717_v34  ;;  %v4918_v34 = vcombine.high %v741_v26, %v745_v27  ;;  %v737_v37 = vld [vmem:[%s5471_s8 + $0xe30] sm:$0xff]  ;;  %v4917_v39 = vcombine.low %v741_v26, %v745_v27  ;;  %v4496_v26 = vcombine.high %v318_v16, %v322_v17 }
 0x1bc   : > { %3839 = vmatprep.subr.bf16.mxu0 %v4838_v51  ;;  %v609_v51 = vld [vmem:[%s5471_s8 + $0xa30] sm:$0xff] }
 0x1bd   : > { %3879 = vmatpush1.bf16.msra.mxu1 %v4845_v35  ;;  %v605_v35 = vld [vmem:[%s5471_s8 + $0xa10] sm:$0xff] }
 0x1be   : > { %3880 = vmatprep.subr.bf16.mxu1 %v4966_v36  ;;  %v733_v36 = vld [vmem:[%s5471_s8 + $0xe10] sm:$0xff]  ;;  %v4782_v40 = vcombine.high %v605_v35, %v609_v51  ;;  %v4781_v49 = vcombine.low %v605_v35, %v609_v51 }
 0x1bf   : > { %3840 = vmatpush2.bf16.msra.mxu0 %v4837_v43  ;;  %v4910_v43 = vcombine.high %v733_v36, %v737_v37  ;;  %v4909_v50 = vcombine.low %v733_v36, %v737_v37  ;;  %v302_v37 = vld [vmem:[%s5471_s8 + $0x98] sm:$0xff] }
 0x1c0   : > { %3841 = vmatprep.subr.bf16.mxu0 %v4830_v44  ;;  %v346_v44 = vld [vmem:[%s5471_s8 + $0x1f8] sm:$0xff] }
 0x1c1   : > { %3881 = vmatpush2.bf16.msra.mxu1 %v4965_v61  ;;  %v342_v61 = vld [vmem:[%s5471_s8 + $0x1d8] sm:$0xff] }
 0x1c2   : > { %3882 = vmatprep.subr.bf16.mxu1 %v4958_v46  ;;  %v470_v46 = vld [vmem:[%s5471_s8 + $0x5d8] sm:$0xff]  ;;  %v4520_v52 = vcombine.high %v342_v61, %v346_v44  ;;  %v4519_v60 = vcombine.low %v342_v61, %v346_v44 }
 0x1c3   : > { %3842 = vmatpush2.bf16.msra.mxu0 %v4829_v53  ;;  %v4648_v53 = vcombine.high %v470_v46, %v474_v47  ;;  %v4647_v62 = vcombine.low %v470_v46, %v474_v47  ;;  %v294_v47 = vld [vmem:[%s5471_s8 + $0x58] sm:$0xff] }
 0x1c4   : > { %3843 = vmatprep.subr.bf16.mxu0 %v4822_v57  ;;  %v338_v57 = vld [vmem:[%s5471_s8 + $0x1b8] sm:$0xff] }
 0x1c5   : > { %3883 = vmatpush2.bf16.msra.mxu1 %v4957_v56  ;;  %v334_v56 = vld [vmem:[%s5471_s8 + $0x198] sm:$0xff] }
 0x1c6   : > { %3884 = vmatprep.subr.bf16.mxu1 %v4950_v58  ;;  %v462_v58 = vld [vmem:[%s5471_s8 + $0x598] sm:$0xff]  ;;  %v4512_v63 = vcombine.high %v334_v56, %v338_v57  ;;  %v4511_v8 = vcombine.low %v334_v56, %v338_v57 }
 0x1c7   : > { %3844 = vmatpush2.bf16.msra.mxu0 %v4821_v1  ;;  %v4640_v1 = vcombine.high %v462_v58, %v466_v59 }
 0x1c8   : > { %3845 = vmatprep.subr.bf16.mxu0 %v4814_v3  ;;  %v330_v3 = vld [vmem:[%s5471_s8 + $0x178] sm:$0xff] }
 0x1c9   : > { %3885 = vmatpush2.bf16.msra.mxu1 %v4949_v2  ;;  %v326_v2 = vld [vmem:[%s5471_s8 + $0x158] sm:$0xff] }
 0x1ca   : > { %3886 = vmatprep.subr.bf16.mxu1 %v4942_v4 }
 0x1cb   : > { %3846 = vmatpush2.bf16.msra.mxu0 %v4813_v9 }
 0x1cc   : > { %3847 = vmatprep.subr.bf16.mxu0 %v4806_v12  ;;  %v4504_v12 = vcombine.high %v326_v2, %v330_v3 }
 0x1cd   : > { %3887 = vmatpush2.bf16.msra.mxu1 %v4941_v11  ;;  %v4639_v11 = vcombine.low %v462_v58, %v466_v59  ;;  %v286_v59 = vld [vmem:[%s5471_s8 + $0x18] sm:$0xff] }
 0x1ce   : > { %3888 = vmatprep.subr.bf16.mxu1 %v4934_v13 }
 0x1cf   : > { %3848 = vmatpush2.bf16.msra.mxu0 %v4805_v19  ;;  %v446_v19 = vld [vmem:[%s5471_s8 + $0x518] sm:$0xff] }
 0x1d0   : > { %3849 = vmatprep.subr.bf16.mxu0 %v4798_v21 }
 0x1d1   : > { %3889 = vmatpush2.bf16.msra.mxu1 %v4933_v20  ;;  %v450_v20 = vld [vmem:[%s5471_s8 + $0x538] sm:$0xff] }
 0x1d2   : > { %3890 = vmatprep.subr.bf16.mxu1 %v4926_v22  ;;  %v4503_v22 = vcombine.low %v326_v2, %v330_v3  ;;  %v4623_v35 = vcombine.low %v446_v19, %v450_v20 }
 0x1d3   : > { %3850 = vmatpush2.bf16.msra.mxu0 %v4797_v28  ;;  %v310_v28 = vld [vmem:[%s5471_s8 + $0xd8] sm:$0xff] }
 0x1d4   : > { %3851 = vmatprep.subr.bf16.mxu0 %v4790_v31  ;;  %v438_v31 = vld [vmem:[%s5471_s8 + $0x4d8] sm:$0xff] }
 0x1d5   : > { %3891 = vmatpush2.bf16.msra.mxu1 %v4925_v30  ;;  %v314_v30 = vld [vmem:[%s5471_s8 + $0xf8] sm:$0xff] }
 0x1d6   : > { %3892 = vmatprep.subr.bf16.mxu1 %v4918_v34  ;;  %v442_v34 = vld [vmem:[%s5471_s8 + $0x4f8] sm:$0xff]  ;;  %v4488_v51 = vcombine.high %v310_v28, %v314_v30 }
 0x1d7   : > { %3852 = vmatpush2.bf16.msra.mxu0 %v4789_v38  ;;  %v4616_v36 = vcombine.high %v438_v31, %v442_v34  ;;  %v306_v38 = vld [vmem:[%s5471_s8 + $0xb8] sm:$0xff]  ;;  %v4615_v61 = vcombine.low %v438_v31, %v442_v34 }
 0x1d8   : > { %3853 = vmatprep.subr.bf16.mxu0 %v4782_v40  ;;  %v434_v40 = vld [vmem:[%s5471_s8 + $0x4b8] sm:$0xff]  ;;  %v4480_v44 = vcombine.high %v302_v37, %v306_v38 }
 0x1d9   : > { %3893 = vmatpush2.bf16.msra.mxu1 %v4917_v39  ;;  %v430_v39 = vld [vmem:[%s5471_s8 + $0x498] sm:$0xff] }
 0x1da   : > { %3894 = vmatprep.subr.bf16.mxu1 %v4910_v43  ;;  %v4487_v43 = vcombine.low %v310_v28, %v314_v30  ;;  %v4608_v46 = vcombine.high %v430_v39, %v434_v40  ;;  %v4607_v56 = vcombine.low %v430_v39, %v434_v40  ;;  %v394_v28 = vld [vmem:[%s5471_s8 + $0x378] sm:$0xff] }
 0x1db   : > { %3854 = vmatpush2.bf16.msra.mxu0 %v4781_v49  ;;  %v298_v49 = vld [vmem:[%s5471_s8 + $0x78] sm:$0xff] }
 0x1dc   : > { %3905 = vmatprep.subr.bf16.mxu0 %v4520_v52  ;;  %v426_v52 = vld [vmem:[%s5471_s8 + $0x478] sm:$0xff]  ;;  %v4472_v57 = vcombine.high %v294_v47, %v298_v49 }
 0x1dd   : > { %3895 = vmatpush2.bf16.msra.mxu1 %v4909_v50  ;;  %v422_v50 = vld [vmem:[%s5471_s8 + $0x458] sm:$0xff] }
 0x1de   : > { %3946 = vmatprep.subr.bf16.mxu1 %v4648_v53  ;;  %v5976_v4 = vpop.f32.mrf.mxu0  ;;  %3856 = vmatmul.mubr.bf16.vlgmr.msra.gmra.mxu0 %v5571_v33  ;;  %v4479_v53 = vcombine.low %v302_v37, %v306_v38  ;;  %v4600_v58 = vcombine.high %v422_v50, %v426_v52  ;;  %v4599_v2 = vcombine.low %v422_v50, %v426_v52  ;;  %v518_v30 = vld [vmem:[%s5471_s8 + $0x758] sm:$0xff] }
 0x1df   : > { %3906 = vmatpush1.bf16.msra.mxu0 %v4519_v60  ;;  %3937 = vmatprep.mubr.bf16.mxu0 %v5548_v10  ;;  %v4624_v10 = vcombine.high %v446_v19, %v450_v20  ;;  %v290_v60 = vld [vmem:[%s5471_s8 + $0x38] sm:$0xff] }
 0x1e0   : > { %v5981_v7 = vpop.f32.mrf.mxu1  ;;  %3897 = vmatmul.mubr.bf16.vlgmr.msra.gmra.mxu1 %v5688_v55  ;;  %v5984_v9 = vpop.f32.mrf.mxu0  ;;  %3907 = vmatprep.subr.bf16.mxu0 %v4512_v63  ;;  %v418_v63 = vld [vmem:[%s5471_s8 + $0x438] sm:$0xff]  ;;  %v4464_v3 = vcombine.high %v286_v59, %v290_v60 }
 0x1e1   : > { %3947 = vmatpush1.bf16.msra.mxu1 %v4647_v62  ;;  %3978 = vmatprep.mubr.bf16.mxu1 %v5555_v14  ;;  %v4495_v14 = vcombine.low %v318_v16, %v322_v17  ;;  %v414_v62 = vld [vmem:[%s5471_s8 + $0x418] sm:$0xff] }
 0x1e2   : > { %v5986_v13 = vpop.f32.mrf.mxu1  ;;  %3948 = vmatprep.subr.bf16.mxu1 %v4640_v1  ;;  %v3615_v18 = vpop.f32.mrf.mxu0  ;;  %v4471_v1 = vcombine.low %v294_v47, %v298_v49  ;;  %v4592_v5 = vcombine.high %v414_v62, %v418_v63  ;;  %v4591_v16 = vcombine.low %v414_v62, %v418_v63  ;;  %v398_v19 = vld [vmem:[%s5471_s8 + $0x398] sm:$0xff] }
 0x1e3   : > { %3908 = vmatpush1.bf16.msra.mxu0 %v4511_v8  ;;  %v410_v8 = vld [vmem:[%s5471_s8 + $0x3f8] sm:$0xff] }
 0x1e4   : > { %v3656_v21 = vpop.f32.mrf.mxu1  ;;  %v3616_v23 = vpop.f32.mrf.mxu0  ;;  %3909 = vmatprep.subr.bf16.mxu0 %v4504_v12  ;;  %v538_v12 = vld [vmem:[%s5471_s8 + $0x7f8] sm:$0xff]  ;;  %v4584_v17 = vcombine.high %v406_v6, %v410_v8 }
 0x1e5   : > { %3949 = vmatpush1.bf16.msra.mxu1 %v4639_v11  ;;  %v534_v11 = vld [vmem:[%s5471_s8 + $0x7d8] sm:$0xff]  ;;  %v4583_v23 = vcombine.low %v406_v6, %v410_v8 }
 0x1e6   : > { %v3657_v27 = vpop.f32.mrf.mxu1  ;;  %3950 = vmatprep.subr.bf16.mxu1 %v4632_v15  ;;  %v4463_v15 = vcombine.low %v286_v59, %v290_v60  ;;  %v4712_v18 = vcombine.high %v534_v11, %v538_v12  ;;  %v402_v20 = vld [vmem:[%s5471_s8 + $0x3b8] sm:$0xff] }
 0x1e7   : > { %3910 = vmatpush1.bf16.msra.mxu0 %v4503_v22  ;;  %v526_v21 = vld [vmem:[%s5471_s8 + $0x798] sm:$0xff]  ;;  %v4575_v34 = vcombine.low %v398_v19, %v402_v20 }
 0x1e8   : > { %3911 = vmatprep.subr.bf16.mxu0 %v4496_v26  ;;  %v530_v22 = vld [vmem:[%s5471_s8 + $0x7b8] sm:$0xff]  ;;  %v4576_v26 = vcombine.high %v398_v19, %v402_v20 }
 0x1e9   : > { %3951 = vmatpush1.bf16.msra.mxu1 %v4631_v25  ;;  %v4711_v25 = vcombine.low %v534_v11, %v538_v12  ;;  %v4704_v27 = vcombine.high %v526_v21, %v530_v22  ;;  %v522_v31 = vld [vmem:[%s5471_s8 + $0x778] sm:$0xff] }
 0x1ea   : > { %3952 = vmatprep.subr.bf16.mxu1 %v4624_v10  ;;  %v390_v10 = vld [vmem:[%s5471_s8 + $0x358] sm:$0xff] }
 0x1eb   : > { %3912 = vmatpush1.bf16.msra.mxu0 %v4495_v14  ;;  %v4703_v14 = vcombine.low %v526_v21, %v530_v22  ;;  %v386_v37 = vld [vmem:[%s5471_s8 + $0x338] sm:$0xff]  ;;  %v4567_v40 = vcombine.low %v390_v10, %v394_v28 }
 0x1ec   : > { %3913 = vmatprep.subr.bf16.mxu0 %v4488_v51  ;;  %v4696_v51 = vcombine.high %v518_v30, %v522_v31  ;;  %v510_v38 = vld [vmem:[%s5471_s8 + $0x718] sm:$0xff] }
 0x1ed   : > { %3953 = vmatpush1.bf16.msra.mxu1 %v4623_v35  ;;  %v4568_v35 = vcombine.high %v390_v10, %v394_v28  ;;  %v514_v39 = vld [vmem:[%s5471_s8 + $0x738] sm:$0xff] }
 0x1ee   : > { %3954 = vmatprep.subr.bf16.mxu1 %v4616_v36  ;;  %v382_v36 = vld [vmem:[%s5471_s8 + $0x318] sm:$0xff] }
 0x1ef   : > { %3914 = vmatpush1.bf16.msra.mxu0 %v4487_v43  ;;  %v4695_v43 = vcombine.low %v518_v30, %v522_v31  ;;  %v378_v47 = vld [vmem:[%s5471_s8 + $0x2f8] sm:$0xff]  ;;  %v4559_v52 = vcombine.low %v382_v36, %v386_v37 }
 0x1f0   : > { %3915 = vmatprep.subr.bf16.mxu0 %v4480_v44  ;;  %v4688_v44 = vcombine.high %v510_v38, %v514_v39  ;;  %v502_v49 = vld [vmem:[%s5471_s8 + $0x6d8] sm:$0xff] }
 0x1f1   : > { %3955 = vmatpush1.bf16.msra.mxu1 %v4615_v61  ;;  %v4560_v61 = vcombine.high %v382_v36, %v386_v37  ;;  %v506_v50 = vld [vmem:[%s5471_s8 + $0x6f8] sm:$0xff] }
 0x1f2   : > { %3956 = vmatprep.subr.bf16.mxu1 %v4608_v46  ;;  %v374_v46 = vld [vmem:[%s5471_s8 + $0x2d8] sm:$0xff] }
 0x1f3   : > { %3916 = vmatpush1.bf16.msra.mxu0 %v4479_v53  ;;  %v4687_v53 = vcombine.low %v510_v38, %v514_v39  ;;  %v370_v59 = vld [vmem:[%s5471_s8 + $0x2b8] sm:$0xff]  ;;  %v4551_v63 = vcombine.low %v374_v46, %v378_v47  ;;  %v5285_v39 = vmov 1983009808  }
 0x1f4   : > { %3917 = vmatprep.subr.bf16.mxu0 %v4472_v57  ;;  %v4680_v57 = vcombine.high %v502_v49, %v506_v50  ;;  %v494_v60 = vld [vmem:[%s5471_s8 + $0x698] sm:$0xff] }
 0x1f5   : > { %3957 = vmatpush1.bf16.msra.mxu1 %v4607_v56  ;;  %v4552_v56 = vcombine.high %v374_v46, %v378_v47  ;;  %v498_v62 = vld [vmem:[%s5471_s8 + $0x6b8] sm:$0xff]  ;;  %v3653_v46 = vadd.f32 %v5981_v7, %v5976_v4 }
 0x1f6   : > { %3958 = vmatprep.subr.bf16.mxu1 %v4600_v58  ;;  %v366_v58 = vld [vmem:[%s5471_s8 + $0x298] sm:$0xff] }
 0x1f7   : > { %3918 = vmatpush1.bf16.msra.mxu0 %v4471_v1  ;;  %v4679_v1 = vcombine.low %v502_v49, %v506_v50  ;;  %v362_v6 = vld [vmem:[%s5471_s8 + $0x278] sm:$0xff]  ;;  %v4543_v12 = vcombine.low %v366_v58, %v370_v59 }
 0x1f8   : > { %3919 = vmatprep.subr.bf16.mxu0 %v4464_v3  ;;  %v4672_v3 = vcombine.high %v494_v60, %v498_v62  ;;  %v486_v8 = vld [vmem:[%s5471_s8 + $0x658] sm:$0xff] }
 0x1f9   : > { %3959 = vmatpush1.bf16.msra.mxu1 %v4599_v2  ;;  %v4544_v2 = vcombine.high %v366_v58, %v370_v59  ;;  %v490_v11 = vld [vmem:[%s5471_s8 + $0x678] sm:$0xff]  ;;  %v3655_v58 = vadd.f32 %v5986_v13, %v5984_v9 }
 0x1fa   : > { %3960 = vmatprep.subr.bf16.mxu1 %v4592_v5  ;;  %v358_v5 = vld [vmem:[%s5471_s8 + $0x258] sm:$0xff] }
 0x1fb   : > { %3920 = vmatpush1.bf16.msra.mxu0 %v4463_v15  ;;  %v4671_v15 = vcombine.low %v494_v60, %v498_v62  ;;  %v354_v19 = vld [vmem:[%s5471_s8 + $0x238] sm:$0xff]  ;;  %v4535_v22 = vcombine.low %v358_v5, %v362_v6 }
 0x1fc   : > { %3921 = vmatprep.subr.bf16.mxu0 %v4584_v17  ;;  %v4664_v17 = vcombine.high %v486_v8, %v490_v11  ;;  %v478_v20 = vld [vmem:[%s5471_s8 + $0x618] sm:$0xff] }
 0x1fd   : > { %3961 = vmatpush1.bf16.msra.mxu1 %v4591_v16  ;;  %v4536_v16 = vcombine.high %v358_v5, %v362_v6  ;;  %v482_v21 = vld [vmem:[%s5471_s8 + $0x638] sm:$0xff] }
 0x1fe   : > { %3962 = vmatprep.subr.bf16.mxu1 %v4712_v18  ;;  %v350_v18 = vld [vmem:[%s5471_s8 + $0x218] sm:$0xff] }
 0x1ff   : > { %3922 = vmatpush2.bf16.msra.mxu0 %v4583_v23  ;;  %v4663_v23 = vcombine.low %v486_v8, %v490_v11  ;;  %v602_v10 = vld [vmem:[%s5471_s8 + $0x9f8] sm:$0xff]  ;;  %v4527_v31 = vcombine.low %v350_v18, %v354_v19 }
 0x200   : > { %3923 = vmatprep.subr.bf16.mxu0 %v4576_v26  ;;  %v4656_v26 = vcombine.high %v478_v20, %v482_v21  ;;  %v726_v28 = vld [vmem:[%s5471_s8 + $0xdd8] sm:$0xff] }
 0x201   : > { %3963 = vmatpush2.bf16.msra.mxu1 %v4711_v25  ;;  %v4528_v25 = vcombine.high %v350_v18, %v354_v19  ;;  %v730_v30 = vld [vmem:[%s5471_s8 + $0xdf8] sm:$0xff] }
 0x202   : > { %3964 = vmatprep.subr.bf16.mxu1 %v4704_v27  ;;  %v598_v27 = vld [vmem:[%s5471_s8 + $0x9d8] sm:$0xff] }
 0x203   : > { %3924 = vmatpush2.bf16.msra.mxu0 %v4575_v34  ;;  %v4655_v34 = vcombine.low %v478_v20, %v482_v21  ;;  %v594_v36 = vld [vmem:[%s5471_s8 + $0x9b8] sm:$0xff] }
 0x204   : > { %3925 = vmatprep.subr.bf16.mxu0 %v4568_v35  ;;  %v4904_v35 = vcombine.high %v726_v28, %v730_v30  ;;  %v718_v37 = vld [vmem:[%s5471_s8 + $0xd98] sm:$0xff] }
 0x205   : > { %3965 = vmatpush2.bf16.msra.mxu1 %v4703_v14  ;;  %v4776_v14 = vcombine.high %v598_v27, %v602_v10  ;;  %v722_v38 = vld [vmem:[%s5471_s8 + $0xdb8] sm:$0xff] }
 0x206   : > { %3966 = vmatprep.subr.bf16.mxu1 %v4696_v51  ;;  %v590_v51 = vld [vmem:[%s5471_s8 + $0x998] sm:$0xff]  ;;  %v4896_v47 = vcombine.high %v718_v37, %v722_v38 }
 0x207   : > { %3926 = vmatpush2.bf16.msra.mxu0 %v4567_v40  ;;  %v4080_v40 = vunpack.c.l.s4 %v5285_v39  ;;  %v582_v49 = vld [vmem:[%s5471_s8 + $0x958] sm:$0xff]  ;;  %v4767_v4 = vcombine.low %v590_v51, %v594_v36 }
 0x208   : > { %3927 = vmatprep.subr.bf16.mxu0 %v4560_v61  ;;  %v4903_v61 = vcombine.low %v726_v28, %v730_v30  ;;  %v586_v50 = vld [vmem:[%s5471_s8 + $0x978] sm:$0xff] }
 0x209   : > { %3967 = vmatpush2.bf16.msra.mxu1 %v4695_v43  ;;  %v4775_v43 = vcombine.low %v598_v27, %v602_v10  ;;  %v4760_v62 = vcombine.high %v582_v49, %v586_v50  ;;  %v578_v9 = vld [vmem:[%s5471_s8 + $0x938] sm:$0xff]  ;;  %v280_v10 = vld [vmem:[#allocation2] sm:$0xff] }
 0x20a   : > { %3968 = vmatprep.subr.bf16.mxu1 %v4688_v44  ;;  %v4768_v44 = vcombine.high %v590_v51, %v594_v36  ;;  %v702_v5 = vld [vmem:[%s5471_s8 + $0xd18] sm:$0xff] }
 0x20b   : > { %3928 = vmatpush2.bf16.msra.mxu0 %v4559_v52  ;;  %v566_v20 = vld [vmem:[%s5471_s8 + $0x8d8] sm:$0xff] }
 0x20c   : > { %3929 = vmatprep.subr.bf16.mxu0 %v4552_v56  ;;  %v714_v56 = vld [vmem:[%s5471_s8 + $0xd78] sm:$0xff] }
 0x20d   : > { %3969 = vmatpush2.bf16.msra.mxu1 %v4687_v53  ;;  %v710_v53 = vld [vmem:[%s5471_s8 + $0xd58] sm:$0xff] }
 0x20e   : > { %3970 = vmatprep.subr.bf16.mxu1 %v4680_v57  ;;  %v4081_v57 = vunpack.c.0.s8 %v4080_v40  ;;  %v570_v21 = vld [vmem:[%s5471_s8 + $0x8f8] sm:$0xff] }
 0x20f   : > { %3930 = vmatpush2.bf16.msra.mxu0 %v4551_v63  ;;  %v4744_v30 = vcombine.high %v566_v20, %v570_v21  ;;  %v4743_v51 = vcombine.low %v566_v20, %v570_v21  ;;  %v550_v39 = vld [vmem:[%s5471_s8 + $0x858] sm:$0xff] }
 0x210   : > { %3931 = vmatprep.subr.bf16.mxu0 %v4544_v2  ;;  %v4888_v2 = vcombine.high %v710_v53, %v714_v56  ;;  %v6067_v6 = vsub.s32 %v4081_v57, %v5520_v45  ;;  %v554_v40 = vld [vmem:[%s5471_s8 + $0x878] sm:$0xff] }
 0x211   : > { %3971 = vmatpush2.bf16.msra.mxu1 %v4679_v1  ;;  %v4727_v57 = vcombine.low %v550_v39, %v554_v40 }
 0x212   : > { %3972 = vmatprep.subr.bf16.mxu1 %v4672_v3  ;;  %v574_v3 = vld [vmem:[%s5471_s8 + $0x918] sm:$0xff] }
 0x213   : > { %3932 = vmatpush2.bf16.msra.mxu0 %v4543_v12  ;;  %v4751_v27 = vcombine.low %v574_v3, %v578_v9 }
 0x214   : > { %3933 = vmatprep.subr.bf16.mxu0 %v4536_v16 }
 0x215   : > { %3973 = vmatpush2.bf16.msra.mxu1 %v4671_v15  ;;  %v4759_v15 = vcombine.low %v582_v49, %v586_v50  ;;  %v542_v50 = vld [vmem:[%s5471_s8 + $0x818] sm:$0xff] }
 0x216   : > { %3974 = vmatprep.subr.bf16.mxu1 %v4664_v17  ;;  %v4752_v17 = vcombine.high %v574_v3, %v578_v9  ;;  %v654_v9 = vld [vmem:[%s5471_s8 + $0xb98] sm:$0xff] }
 0x217   : > { %3934 = vmatpush2.bf16.msra.mxu0 %v4535_v22  ;;  %v694_v22 = vld [vmem:[%s5471_s8 + $0xcd8] sm:$0xff] }
 0x218   : > { %3935 = vmatprep.subr.bf16.mxu0 %v4528_v25  ;;  %v4085_v25 = vrot.slane %v4077_v48, %v6067_v6 }
 0x219   : > { %3975 = vmatpush2.bf16.msra.mxu1 %v4663_v23  ;;  %v698_v23 = vld [vmem:[%s5471_s8 + $0xcf8] sm:$0xff] }
 0x21a   : > { %3976 = vmatprep.subr.bf16.mxu1 %v4656_v26  ;;  %v4871_v36 = vcombine.low %v694_v22, %v698_v23 }
 0x21b   : > { %3936 = vmatpush2.bf16.msra.mxu0 %v4527_v31 }
 0x21c   : > { %3987 = vmatprep.subr.bf16.mxu0 %v4776_v14  ;;  %v558_v14 = vld [vmem:[%s5471_s8 + $0x898] sm:$0xff] }
 0x21d   : > { %3977 = vmatpush2.bf16.msra.mxu1 %v4655_v34  ;;  %v4872_v34 = vcombine.high %v694_v22, %v698_v23  ;;  %v638_v22 = vld [vmem:[%s5471_s8 + $0xb18] sm:$0xff] }
 0x21e   : > { %4028 = vmatprep.subr.bf16.mxu1 %v4904_v35  ;;  %v3693_v52 = vpop.f32.mrf.mxu0  ;;  %3938 = vmatmul.mubr.bf16.vlgmr.msra.gmra.mxu0 %v5601_v24  ;;  %v4895_v24 = vcombine.low %v718_v37, %v722_v38  ;;  %v562_v35 = vld [vmem:[%s5471_s8 + $0x8b8] sm:$0xff]  ;;  %v4864_v38 = vcombine.high %v686_v29, %v690_v41 }
 0x21f   : > { %v3694_v59 = vadd.f32 %v3693_v52, %v3653_v46  ;;  %3988 = vmatpush1.bf16.msra.mxu0 %v4775_v43  ;;  %4019 = vmatprep.mubr.bf16.mxu0 %v5608_v32  ;;  %v4887_v32 = vcombine.low %v710_v53, %v714_v56  ;;  %v4736_v37 = vcombine.high %v558_v14, %v562_v35  ;;  %v678_v43 = vld [vmem:[%s5471_s8 + $0xc58] sm:$0xff] }
 0x220   : > { %v3734_v60 = vpop.f32.mrf.mxu1  ;;  %3979 = vmatmul.mubr.bf16.vlgmr.msra.gmra.mxu1 %v5612_v0  ;;  %v3695_v7 = vpop.f32.mrf.mxu0  ;;  %3989 = vmatprep.subr.bf16.mxu0 %v4768_v44  ;;  %v706_v0 = vld [vmem:[%s5471_s8 + $0xd38] sm:$0xff]  ;;  %v4735_v44 = vcombine.low %v558_v14, %v562_v35  ;;  %v4863_v46 = vcombine.low %v686_v29, %v690_v41 }
 0x221   : > { %4029 = vmatpush1.bf16.msra.mxu1 %v4903_v61  ;;  %v3696_v63 = vadd.f32 %v3695_v7, %v3655_v58  ;;  %4060 = vmatprep.mubr.bf16.mxu1 %v5621_v42  ;;  %v3735_v8 = vadd.f32 %v3734_v60, %v3694_v59  ;;  %v4880_v42 = vcombine.high %v702_v5, %v706_v0  ;;  %v682_v61 = vld [vmem:[%s5471_s8 + $0xc78] sm:$0xff] }
 0x222   : > { %v3736_v1 = vpop.f32.mrf.mxu1  ;;  %4030 = vmatprep.subr.bf16.mxu1 %v4896_v47  ;;  %v3697_v13 = vpop.f32.mrf.mxu0  ;;  %v4879_v28 = vcombine.low %v702_v5, %v706_v0  ;;  %v4728_v47 = vcombine.high %v550_v39, %v554_v40  ;;  %v4856_v49 = vcombine.high %v678_v43, %v682_v61  ;;  %v546_v52 = vld [vmem:[%s5471_s8 + $0x838] sm:$0xff]  ;;  %v4855_v58 = vcombine.low %v678_v43, %v682_v61 }
 0x223   : > { %v3737_v11 = vadd.f32 %v3736_v1, %v3696_v63  ;;  %3990 = vmatpush1.bf16.msra.mxu0 %v4767_v4  ;;  %v670_v53 = vld [vmem:[%s5471_s8 + $0xc18] sm:$0xff]  ;;  %v4720_v59 = vcombine.high %v542_v50, %v546_v52  ;;  %v4719_v63 = vcombine.low %v542_v50, %v546_v52 }
 0x224   : > { %v3738_v12 = vpop.f32.mrf.mxu1  ;;  %v3698_v16 = vpop.f32.mrf.mxu0  ;;  %3991 = vmatprep.subr.bf16.mxu0 %v4760_v62  ;;  %v674_v56 = vld [vmem:[%s5471_s8 + $0xc38] sm:$0xff] }
 0x225   : > { %4031 = vmatpush1.bf16.msra.mxu1 %v4895_v24  ;;  %v4078_v18 = vcombine.low %v3735_v8, %v3737_v11  ;;  %v4848_v60 = vcombine.high %v670_v53, %v674_v56  ;;  %v662_v4 = vld [vmem:[%s5471_s8 + $0xbd8] sm:$0xff]  ;;  %v4847_v1 = vcombine.low %v670_v53, %v674_v56 }
 0x226   : > { %v3739_v19 = vpop.f32.mrf.mxu1  ;;  %4032 = vmatprep.subr.bf16.mxu1 %v4888_v2  ;;  %v666_v7 = vld [vmem:[%s5471_s8 + $0xbf8] sm:$0xff] }
 0x227   : > { %v4092_v26 = vrot.slane %v4078_v18, %v6067_v6  ;;  %3992 = vmatpush1.bf16.msra.mxu0 %v4759_v15  ;;  %v790_v24 = vld [vmem:[%s5471_s8 + $0xfd8] sm:$0xff]  ;;  %v4840_v2 = vcombine.high %v662_v4, %v666_v7  ;;  %v4839_v8 = vcombine.low %v662_v4, %v666_v7 }
 0x228   : > { %3993 = vmatprep.subr.bf16.mxu0 %v4752_v17  ;;  %v794_v62 = vld [vmem:[%s5471_s8 + $0xff8] sm:$0xff] }
 0x229   : > { %4033 = vmatpush1.bf16.msra.mxu1 %v4887_v32  ;;  %v4093_v31 = vcombine.low %v4085_v25, %v4092_v26  ;;  %v4968_v3 = vcombine.high %v790_v24, %v794_v62  ;;  %v658_v13 = vld [vmem:[%s5471_s8 + $0xbb8] sm:$0xff]  ;;  %v4967_v11 = vcombine.low %v790_v24, %v794_v62 }
 0x22a   : > { %4034 = vmatprep.subr.bf16.mxu1 %v4880_v42  ;;  %v782_v5 = vld [vmem:[%s5471_s8 + $0xf98] sm:$0xff]  ;;  %v4832_v12 = vcombine.high %v654_v9, %v658_v13  ;;  %v4831_v19 = vcombine.low %v654_v9, %v658_v13 }
 0x22b   : > { %v4113_v48 = vadd.f32 %v4093_v31, %v280_v10  ;;  %3994 = vmatpush1.bf16.msra.mxu0 %v4751_v27  ;;  %v786_v0 = vld [vmem:[%s5471_s8 + $0xfb8] sm:$0xff] }
 0x22c   : > { %3995 = vmatprep.subr.bf16.mxu0 %v4744_v30  ;;  %v4960_v15 = vcombine.high %v782_v5, %v786_v0  ;;  %v646_v16 = vld [vmem:[%s5471_s8 + $0xb58] sm:$0xff]  ;;  %v4959_v42 = vcombine.low %v782_v5, %v786_v0 }
 0x22d   : > { %4035 = vmatpush1.bf16.msra.mxu1 %v4879_v28  ;;  %4115 = vst [vmem:[#allocation2] sm:$0xff] %v4113_v48  ;;  %v650_v32 = vld [vmem:[%s5471_s8 + $0xb78] sm:$0xff] }
 0x22e   : > { %4036 = vmatprep.subr.bf16.mxu1 %v4872_v34  ;;  %v774_v17 = vld [vmem:[%s5471_s8 + $0xf58] sm:$0xff]  ;;  %v4824_v20 = vcombine.high %v646_v16, %v650_v32  ;;  %v4823_v27 = vcombine.low %v646_v16, %v650_v32 }
 0x22f   : > { %3996 = vmatpush1.bf16.msra.mxu0 %v4743_v51  ;;  %v778_v18 = vld [vmem:[%s5471_s8 + $0xf78] sm:$0xff] }
 0x230   : > { %3997 = vmatprep.subr.bf16.mxu0 %v4736_v37  ;;  %v4952_v21 = vcombine.high %v774_v17, %v778_v18  ;;  %v642_v23 = vld [vmem:[%s5471_s8 + $0xb38] sm:$0xff]  ;;  %v4951_v10 = vcombine.low %v774_v17, %v778_v18 }
 0x231   : > { %4037 = vmatpush1.bf16.msra.mxu1 %v4871_v36  ;;  %v766_v25 = vld [vmem:[%s5471_s8 + $0xf18] sm:$0xff]  ;;  %v4816_v28 = vcombine.high %v638_v22, %v642_v23  ;;  %v4815_v29 = vcombine.low %v638_v22, %v642_v23 }
 0x232   : > { %4038 = vmatprep.subr.bf16.mxu1 %v4864_v38  ;;  %v770_v26 = vld [vmem:[%s5471_s8 + $0xf38] sm:$0xff] }
 0x233   : > { %3998 = vmatpush1.bf16.msra.mxu0 %v4735_v44  ;;  %v4944_v30 = vcombine.high %v766_v25, %v770_v26  ;;  %v630_v31 = vld [vmem:[%s5471_s8 + $0xad8] sm:$0xff]  ;;  %v4943_v41 = vcombine.low %v766_v25, %v770_v26 }
 0x234   : > { %3999 = vmatprep.subr.bf16.mxu0 %v4728_v47  ;;  %v634_v34 = vld [vmem:[%s5471_s8 + $0xaf8] sm:$0xff] }
 0x235   : > { %4039 = vmatpush1.bf16.msra.mxu1 %v4863_v46  ;;  %v758_v14 = vld [vmem:[%s5471_s8 + $0xed8] sm:$0xff]  ;;  %v4808_v48 = vcombine.high %v630_v31, %v634_v34  ;;  %v4807_v40 = vcombine.low %v630_v31, %v634_v34 }
 0x236   : > { %4040 = vmatprep.subr.bf16.mxu1 %v4856_v49  ;;  %v762_v35 = vld [vmem:[%s5471_s8 + $0xef8] sm:$0xff] }
 0x237   : > { %4000 = vmatpush1.bf16.msra.mxu0 %v4727_v57  ;;  %v4936_v51 = vcombine.high %v758_v14, %v762_v35  ;;  %v622_v36 = vld [vmem:[%s5471_s8 + $0xa98] sm:$0xff]  ;;  %v4935_v43 = vcombine.low %v758_v14, %v762_v35 }
 0x238   : > { %4001 = vmatprep.subr.bf16.mxu0 %v4720_v59  ;;  %v626_v37 = vld [vmem:[%s5471_s8 + $0xab8] sm:$0xff] }
 0x239   : > { %4041 = vmatpush1.bf16.msra.mxu1 %v4855_v58  ;;  %v750_v38 = vld [vmem:[%s5471_s8 + $0xe98] sm:$0xff]  ;;  %v4800_v61 = vcombine.high %v622_v36, %v626_v37  ;;  %v4799_v52 = vcombine.low %v622_v36, %v626_v37 }
 0x23a   : > { %4042 = vmatprep.subr.bf16.mxu1 %v4848_v60  ;;  %v754_v39 = vld [vmem:[%s5471_s8 + $0xeb8] sm:$0xff] }
 0x23b   : > { %4002 = vmatpush1.bf16.msra.mxu0 %v4719_v63  ;;  %v4928_v44 = vcombine.high %v750_v38, %v754_v39  ;;  %v614_v46 = vld [vmem:[%s5471_s8 + $0xa58] sm:$0xff]  ;;  %v4927_v53 = vcombine.low %v750_v38, %v754_v39 }
 0x23c   : > { %4003 = vmatprep.subr.bf16.mxu0 %v4840_v2  ;;  %v618_v47 = vld [vmem:[%s5471_s8 + $0xa78] sm:$0xff] }
 0x23d   : > { %4043 = vmatpush1.bf16.msra.mxu1 %v4847_v1  ;;  %v742_v49 = vld [vmem:[%s5471_s8 + $0xe58] sm:$0xff]  ;;  %v4792_v56 = vcombine.high %v614_v46, %v618_v47  ;;  %v4791_v7 = vcombine.low %v614_v46, %v618_v47 }
 0x23e   : > { %4044 = vmatprep.subr.bf16.mxu1 %v4968_v3  ;;  %v746_v50 = vld [vmem:[%s5471_s8 + $0xe78] sm:$0xff] }
 0x23f   : > { %4004 = vmatpush2.bf16.msra.mxu0 %v4839_v8  ;;  %v4920_v57 = vcombine.high %v742_v49, %v746_v50  ;;  %v606_v58 = vld [vmem:[%s5471_s8 + $0xa18] sm:$0xff]  ;;  %v4919_v24 = vcombine.low %v742_v49, %v746_v50 }
 0x240   : > { %4005 = vmatprep.subr.bf16.mxu0 %v4832_v12  ;;  %v610_v59 = vld [vmem:[%s5471_s8 + $0xa38] sm:$0xff] }
 0x241   : > { %4045 = vmatpush2.bf16.msra.mxu1 %v4967_v11  ;;  %v734_v60 = vld [vmem:[%s5471_s8 + $0xe18] sm:$0xff]  ;;  %v4784_v62 = vcombine.high %v606_v58, %v610_v59  ;;  %v4783_v1 = vcombine.low %v606_v58, %v610_v59 }
 0x242   : > { %4046 = vmatprep.subr.bf16.mxu1 %v4960_v15  ;;  %v738_v4 = vld [vmem:[%s5471_s8 + $0xe38] sm:$0xff] }
 0x243   : > { %4006 = vmatpush2.bf16.msra.mxu0 %v4831_v19  ;;  %v4912_v63 = vcombine.high %v734_v60, %v738_v4  ;;  %v4911_v2 = vcombine.low %v734_v60, %v738_v4 }
 0x244   : > { %4007 = vmatprep.subr.bf16.mxu0 %v4824_v20 }
 0x245   : > { %4047 = vmatpush2.bf16.msra.mxu1 %v4959_v42 }
 0x246   : > { %4048 = vmatprep.subr.bf16.mxu1 %v4952_v21 }
 0x247   : > { %4008 = vmatpush2.bf16.msra.mxu0 %v4823_v27 }
 0x248   : > { %4009 = vmatprep.subr.bf16.mxu0 %v4816_v28 }
 0x249   : > { %4049 = vmatpush2.bf16.msra.mxu1 %v4951_v10 }
 0x24a   : > { %4050 = vmatprep.subr.bf16.mxu1 %v4944_v30 }
 0x24b   : > { %4010 = vmatpush2.bf16.msra.mxu0 %v4815_v29 }
 0x24c   : > { %4011 = vmatprep.subr.bf16.mxu0 %v4808_v48 }
 0x24d   : > { %4051 = vmatpush2.bf16.msra.mxu1 %v4943_v41 }
 0x24e   : > { %4052 = vmatprep.subr.bf16.mxu1 %v4936_v51 }
 0x24f   : > { %4012 = vmatpush2.bf16.msra.mxu0 %v4807_v40 }
 0x250   : > { %4013 = vmatprep.subr.bf16.mxu0 %v4800_v61 }
 0x251   : > { %4053 = vmatpush2.bf16.msra.mxu1 %v4935_v43 }
 0x252   : > { %4054 = vmatprep.subr.bf16.mxu1 %v4928_v44 }
 0x253   : > { %4014 = vmatpush2.bf16.msra.mxu0 %v4799_v52 }
 0x254   : > { %4015 = vmatprep.subr.bf16.mxu0 %v4792_v56 }
 0x255   : > { %4055 = vmatpush2.bf16.msra.mxu1 %v4927_v53  ;;  %v281_v53 = vld [vmem:[#allocation2 + $0x8] sm:$0xff] }
 0x256   : > { %4056 = vmatprep.subr.bf16.mxu1 %v4920_v57 }
 0x257   : > { %4016 = vmatpush2.bf16.msra.mxu0 %v4791_v7 }
 0x258   : > { %4017 = vmatprep.subr.bf16.mxu0 %v4784_v62 }
 0x259   : > { %4057 = vmatpush2.bf16.msra.mxu1 %v4919_v24 }
 0x25a   : > { %4058 = vmatprep.subr.bf16.mxu1 %v4912_v63 }
 0x25b   : > { %4018 = vmatpush2.bf16.msra.mxu0 %v4783_v1 }
 0x25d   : > { %4059 = vmatpush2.bf16.msra.mxu1 %v4911_v2 }
 0x25e   : > { %v3775_v3 = vpop.f32.mrf.mxu0  ;;  %4020 = vmatmul.mubr.bf16.vlgmr.msra.gmra.mxu0 %v5571_v33 }
 0x260   : > { %v3816_v9 = vpop.f32.mrf.mxu1  ;;  %4061 = vmatmul.mubr.bf16.vlgmr.msra.gmra.mxu1 %v5688_v55  ;;  %v3777_v5 = vpop.f32.mrf.mxu0 }
 0x261   : > { %v3817_v13 = vadd.f32 %v3816_v9, %v3775_v3 }
 0x262   : > { %v3818_v0 = vpop.f32.mrf.mxu1  ;;  %v3779_v11 = vpop.f32.mrf.mxu0 }
 0x263   : > { %v3819_v8 = vadd.f32 %v3818_v0, %v3777_v5 }
 0x264   : > { %v3820_v12 = vpop.f32.mrf.mxu1  ;;  %v3780_v15 = vpop.f32.mrf.mxu0 }
 0x266   : > { %v3821_v16 = vpop.f32.mrf.mxu1 }
 0x29e   : > { %v3857_v32 = vpop.f32.mrf.mxu0 }
 0x29f   : > { %v3858_v17 = vadd.f32 %v3857_v32, %v3817_v13 }
 0x2a0   : > { %v3898_v18 = vpop.f32.mrf.mxu1  ;;  %v3859_v19 = vpop.f32.mrf.mxu0 }
 0x2a1   : > { %v3899_v42 = vadd.f32 %v3898_v18, %v3858_v17  ;;  %v3860_v20 = vadd.f32 %v3859_v19, %v3819_v8 }
 0x2a2   : > { %v3900_v21 = vpop.f32.mrf.mxu1  ;;  %v3861_v22 = vpop.f32.mrf.mxu0 }
 0x2a3   : > { %v3901_v33 = vadd.f32 %v3900_v21, %v3860_v20 }
 0x2a4   : > { %v3902_v23 = vpop.f32.mrf.mxu1  ;;  %v3862_v25 = vpop.f32.mrf.mxu0 }
 0x2a5   : > { %v4094_v55 = vcombine.low %v3899_v42, %v3901_v33 }
 0x2a6   : > { %v3903_v26 = vpop.f32.mrf.mxu1 }
 0x2a7   : > { %v4102_v50 = vrot.slane %v4094_v55, %v6067_v6 }
 0x2de   : > { %v3939_v27 = vpop.f32.mrf.mxu0 }
 0x2e0   : > { %v3980_v10 = vpop.f32.mrf.mxu1  ;;  %v3941_v28 = vpop.f32.mrf.mxu0 }
 0x2e1   : > { %v3981_v29 = vadd.f32 %v3980_v10, %v3939_v27 }
 0x2e2   : > { %v3982_v30 = vpop.f32.mrf.mxu1  ;;  %v3943_v31 = vpop.f32.mrf.mxu0 }
 0x2e3   : > { %v3983_v48 = vadd.f32 %v3982_v30, %v3941_v28 }
 0x2e4   : > { %v3984_v34 = vpop.f32.mrf.mxu1  ;;  %v3944_v14 = vpop.f32.mrf.mxu0 }
 0x2e6   : > { %v3985_v35 = vpop.f32.mrf.mxu1 }
 0x31e   : > { %v4021_v41 = vpop.f32.mrf.mxu0 }
 0x31f   : > { %v4022_v51 = vadd.f32 %v4021_v41, %v3981_v29 }
 0x320   : > { %v4062_v36 = vpop.f32.mrf.mxu1  ;;  %v4023_v37 = vpop.f32.mrf.mxu0 }
 0x321   : > { %v4024_v38 = vadd.f32 %v4023_v37, %v3983_v48  ;;  %v4063_v43 = vadd.f32 %v4062_v36, %v4022_v51 }
 0x322   : > { %v4064_v39 = vpop.f32.mrf.mxu1  ;;  %v4025_v40 = vpop.f32.mrf.mxu0 }
 0x323   : > { %v4065_v61 = vadd.f32 %v4064_v39, %v4024_v38 }
 0x324   : > { %v4066_v44 = vpop.f32.mrf.mxu1  ;;  %v4026_v46 = vpop.f32.mrf.mxu0 }
 0x325   : > { %v4095_v47 = vcombine.low %v4063_v43, %v4065_v61 }
 0x326   : > { %v4067_v49 = vpop.f32.mrf.mxu1 }
 0x327   : > { %v4109_v52 = vrot.slane %v4095_v47, %v6067_v6 }
 0x329   : > { %v4110_v56 = vcombine.low %v4102_v50, %v4109_v52  ;;  %4120 = sbr.rel (%p4969_p10) target bundleno = 846 (0x34e), region = 48 }
 0x32b   : > { %v4114_v57 = vadd.f32 %v4110_v56, %v281_v53 }
 0x32d   : > { %4116 = vst [vmem:[#allocation2 + $0x8] sm:$0xff] %v4114_v57 }
 0x32e   : > { %v4123_v58 = vld [vmem:[%s5482_s11] sm:$0xff]  ;;  %v4127_v59 = vsub.s32 0, %v5520_v45  ;;  %v4131_v60 = vsub.s32 1, %v5520_v45  ;;  %v4135_v4 = vsub.s32 2, %v5520_v45  ;;  %v4139_v7 = vsub.s32 3, %v5520_v45  ;;  %v4121_v42 = vld [vmem:[#allocation2] sm:$0xff] }
 0x32f   : > { %v4143_v24 = vsub.s32 4, %v5520_v45  ;;  %v4147_v62 = vsub.s32 5, %v5520_v45  ;;  %v4151_v63 = vsub.s32 6, %v5520_v45  ;;  %v4155_v9 = vsub.s32 7, %v5520_v45 }
 0x330   : > { %v4128_v1 = vrot.slane %v4123_v58, %v4127_v59  ;;  %v4132_v2 = vrot.slane %v4123_v58, %v4131_v60  ;;  %v4136_v3 = vrot.slane %v4123_v58, %v4135_v4  ;;  %v4140_v13 = vrot.slane %v4123_v58, %v4139_v7 }
 0x331   : > { %v4144_v5 = vrot.slane %v4123_v58, %v4143_v24  ;;  %v4148_v0 = vrot.slane %v4123_v58, %v4147_v62  ;;  %v4152_v8 = vrot.slane %v4123_v58, %v4151_v63  ;;  %v4156_v11 = vrot.slane %v4123_v58, %v4155_v9 }
 0x332   : > { %v4157_v12 = vcombine.low %v4128_v1, %v4132_v2  ;;  %v4158_v15 = vcombine.low %v4136_v3, %v4140_v13 }
 0x333   : > { %v4174_v16 = vcombine.low %v4144_v5, %v4148_v0  ;;  %v4175_v17 = vcombine.low %v4152_v8, %v4156_v11 }
 0x334   : > { %v4165_v32 = vrot.slane %v4157_v12, %v6067_v6  ;;  %v4172_v18 = vrot.slane %v4158_v15, %v6067_v6  ;;  %v4122_v21 = vld [vmem:[#allocation2 + $0x8] sm:$0xff] }
 0x335   : > { %v4182_v19 = vrot.slane %v4174_v16, %v6067_v6  ;;  %v4189_v20 = vrot.slane %v4175_v17, %v6067_v6 }
 0x336   : > { %v4173_v45 = vcombine.low %v4165_v32, %v4172_v18 }
 0x337   : > { %v4190_v22 = vcombine.low %v4182_v19, %v4189_v20 }
 0x338   : > { %v4193_v33 = vadd.f32 %v4173_v45, %v4121_v42 }
 0x339   : > { %v4194_v23 = vadd.f32 %v4190_v22, %v4122_v21 }
 0x33a   : > { %v4195_v25 = vmax.f32 %v4193_v33, 0.0 }
 0x33b   : > { %v4196_v55 = vmax.f32 %v4194_v23, 0.0 }
 0x33c   : > { %v4199_v26 = vcombine.high %v4195_v25, %v4195_v25  ;;  %v4206_v27 = vrot.slane %v4195_v25, %v6067_v6 }
 0x33d   : > { %v4216_v10 = vcombine.high %v4196_v55, %v4196_v55  ;;  %v4223_v28 = vrot.slane %v4196_v55, %v6067_v6 }
 0x33e   : > { %v4213_v30 = vrot.slane %v4199_v26, %v6067_v6  ;;  %v4214_v31 = vcombine.high %v4206_v27, %v4206_v27 }
 0x33f   : > { %v4230_v34 = vrot.slane %v4216_v10, %v6067_v6  ;;  %v4231_v14 = vcombine.high %v4223_v28, %v4223_v28 }
 0x340   : > { %v4215_v35 = vcombine.high %v4213_v30, %v4213_v30  ;;  %v4970_v29 = vpack.c.bf16 %v4214_v31, %v4206_v27 }
 0x341   : > { %v4232_v41 = vcombine.high %v4230_v34, %v4230_v34  ;;  %v4972_v48 = vpack.c.bf16 %v4231_v14, %v4223_v28 }
 0x342   : > { %v4971_v51 = vpack.c.bf16 %v4215_v35, %v4213_v30  ;;  %v4267_v36 = vrot.slane %v4970_v29, %v5527_v54 }
 0x343   : > { %v4973_v37 = vpack.c.bf16 %v4232_v41, %v4230_v34  ;;  %v4281_v38 = vrot.slane %v4972_v48, %v5527_v54 }
 0x344   : > { %v4274_v39 = vrot.slane %v4971_v51, %v5527_v54 }
 0x345   : > { %v4288_v40 = vrot.slane %v4973_v37, %v5527_v54 }
 0x346   : > { %v4289_v43 = vcombine.low %v4267_v36, %v4274_v39 }
 0x347   : > { %v4290_v61 = vcombine.low %v4281_v38, %v4288_v40 }
 0x348   : > { %v4297_v6 = vrot.slane %v4289_v43, %v5527_v54 }
 0x349   : > { %v4304_v44 = vrot.slane %v4290_v61, %v5527_v54 }
 0x34b   : > { %v4305_v46 = vcombine.low %v4297_v6, %v4304_v44 }
 0x34d   : > { %4307 = vst [vmem:[%s5495_s26] sm:$0xff] %v4305_v46 }
 0x34e PF: > { %s4981_s18 = sshll.u32 %s5264_s19, 7  ;;  %s4323_s8 = sshll.u32 %s5495_s26, 4  ;;  %s4324_s8 = int_to_ptr.vmem [resolvable:$true] %s4323_s8 }
 0x34f   : > { %s4321_s25 = scalar_lea.hbm %s6209_s3, %s4981_s18  ;;  %s4309_s23 = scalar_lea.sflag [#allocation5], %s5478_s21 }
 0x350   : > { %s5152_s5 = scalar_lea.vmem %s4324_s8, 128  ;;  %p6228_p3 = scmp.ne.s32.totalorder %s6224_s27, 0 }
 0x351   : > { %p5153_p11 = scmp.ne.s32.totalorder %s4324_s8, %s5152_s5  ;;  %s5286_s11 = smov [#allocation8]  }
 0x352   : > { %s5156_s4 = sshll.u32 %s5286_s11, 4  ;;  %s5157_s4 = int_to_ptr.vmem [resolvable:$false] %s5156_s4 }
 0x353   : > { %p5154_p5 = pnand %p5153_p11, %p6228_p3  ;;  %s5158_s10 = scalar_lea.vmem %s5157_s4, 256 }
 0x354   : > { %p5159_p12 = scmp.lt.s32.totalorder %s4324_s8, %s5157_s4  ;;  %p5160_p2 = scmp.lt.s32.totalorder %s5158_s10, %s5152_s5 }
 0x355   : > { %p5155_p9 = pneg %p5154_p5 }
 0x356   : > { %p5161_p6 = por %p5160_p2, %p5159_p12 }
 0x358   : > { %p5162_p0 = pnand %p5161_p6, %p5155_p9 }
 0x35a   : > { %5165 = shalt.err (!%p5162_p0)
}
 0x35b   : > { %s5166_s19 = scalar_lea.hbm %s4321_s25, 128  ;;  %s5170_s29 = scalar_lea.hbm %s6209_s3, 512 }
 0x35c   : > { %p5167_p13 = scmp.ne.s32.totalorder %s4321_s25, %s5166_s19  ;;  %p5171_p4 = scmp.lt.s32.totalorder %s4321_s25, %s6209_s3 }
 0x35d   : > { %p5172_p7 = scmp.lt.s32.totalorder %s5170_s29, %s5166_s19 }
 0x35e   : > { %p5168_p1 = pnand %p5167_p13, %p6228_p3 }
 0x35f   : > { %p5173_p10 = por %p5172_p7, %p5171_p4 }
 0x360   : > { %p5169_p8 = pneg %p5168_p1 }
 0x362   : > { %p5174_p11 = pnand %p5173_p10, %p5169_p8 }
 0x364   : > { %5177 = shalt.err (!%p5174_p11)
}
 0x365   : > { %4986 = dma.vmem_to_hbm [thread:$0]  (%p6228_p3), %s4324_s8, 128, %s4321_s25, %s4309_s23  }
 0x366 PF: > { %p5000_p5 = scmp.ge.s32.totalorder %s5276_s22, 2  ;;  %s4335_s24 = sand.u32 1, %s5236_s12  }
 0x367   : > { %p6229_p9 = scmp.ne.s32.totalorder %s6226_s6, 0  ;;  %s4336_s18 = scalar_lea.sflag [#allocation5], %s4335_s24 }
 0x369   : > { %p4996_p12 = pnand %p5000_p5, %p6229_p9 }
 0x36b   : > { %p4997_p2 = pneg %p4996_p12 }
 0x36d   : > { %5231 = dma.done.wait (%p4997_p2), %s4336_s18, 128  }
 0x36e   : > { %5233 = vsyncadd (%p4997_p2), %s4336_s18, 4294967168  ;;  %s22_s22 = sadd.s32 1, %s5276_s22   ;;  %s6230_s19 = sld [smem:[#allocation12_spill]] }
 0x36f   : > { %p19_p6 = scmp.ge.s32.totalorder %s22_s22, 38   ;;  %s6231_s27 = sld [smem:[#allocation13_spill]] }
 0x370   : > { %s6232_s21 = sld [smem:[#allocation14_spill]]  ;;  %s6233_s12 = smov %s5240_s13 }
 0x371   : > { %s6234_s13 = smov %s5244_s14  ;;  %s6235_s14 = smov %s5437_s28 }
 0x372   : > { %s6236_s15 = smov %s5252_s16  ;;  %s6237_s16 = smov %s5256_s17 }
 0x373   : > { %s6238_s17 = smov %s5442_s30  ;;  %s6239_s18 = smov %s5268_s20 }
 0x374   :  { %21 = sbr.rel (!%p19_p6) target bundleno = 13 (0xd), region = 101 }
 0x375   : > { %s6240_s20 = smov %s6231_s27 }
 0x379   :  { %4341 = vsyncpa [#allocation4], 1 }
 0x37a   :  { %4343 = vsyncpa [#allocation4 + $0x1], 1 }
 0x37b   :  { %4344 = vsyncpa [#allocation7], 1 }
 0x37c   :  { %4346 = vsyncpa [#allocation7 + $0x1], 1 }
 0x37d   :  { %4347 = vsyncpa [#allocation5], 1 }
 0x37e   :  { %4349 = vsyncpa [#allocation5 + $0x1], 1 }

</bundles_post_ra>
